<compile_context>
chip_gen: v6e
topology: v6e:2x2x1
jax: 0.10.0
libtpu: 0.0.40
codegen_flags: <defaults>
</compile_context>

<pallas_src>
import math

import jax
import jax.numpy as jnp
from jax.experimental import pallas as pl
from jax.experimental.pallas import tpu as pltpu

# ----------------- small synthetic BERT config -----------------
VOCAB = 100
MAX_POS = 16
TYPE_VOCAB = 2
HIDDEN = 32
NUM_HEADS = 2
HEAD_DIM = HIDDEN // NUM_HEADS
INTERMEDIATE = 64
NUM_LAYERS = 2
NUM_CLASSES = 4
SEQ = 8
BATCH = 2
LN_EPS = 1e-12        # BertLayerNorm eps
LANE_PAD = 128        # lane-dense output width


# ----------------- in-kernel helpers -----------------
def _ln(x, gamma, beta):
    mu = jnp.mean(x, axis=-1, keepdims=True)
    var = jnp.mean((x - mu) ** 2, axis=-1, keepdims=True)
    return (x - mu) * jax.lax.rsqrt(var + LN_EPS) * gamma + beta


def _gelu(x):
    # TODO(synk): HF BERT uses exact erf-GELU; tanh approximation used here.
    return 0.5 * x * (1.0 + jnp.tanh(0.7978845608028654 * (x + 0.044715 * x * x * x)))


# ----------------- fully fused kernel (one batch element per grid program) -----------------
def fused_bert_kernel(ids_ref,                                   # scalar prefetch (SMEM)
                      maskb_ref, word_ref, pos_ref, type_ref, eg_ref, eb_ref,
                      wqkv_ref, bqkv_ref, wo_ref, bo_ref, l1g_ref, l1b_ref,
                      w1_ref, b1_ref, w2_ref, b2_ref, l2g_ref, l2b_ref,
                      wp_ref, bp_ref, wc_ref, bc_ref,
                      o_ref, x_scr):
    b = pl.program_id(0)
    NH, DH, S, H = NUM_HEADS, HEAD_DIM, SEQ, HIDDEN
    scale = 1.0 / math.sqrt(DH)

    # ---- embedding gather: word[ids] + pos + type0, entirely in-kernel ----
    for si in range(S):
        tok = ids_ref[b, si]                                      # SMEM scalar
        x_scr[pl.ds(si, 1), :] = word_ref[pl.ds(tok, 1), :]       # dynamic row gather
    x = _ln(x_scr[...] + pos_ref[...] + type_ref[...], eg_ref[...], eb_ref[...])   # (S, H) f32

    # padding-mask bias along the key dim; broadcast once (hoisted out of the layer loop)
    mask_b = jnp.broadcast_to(maskb_ref[...].reshape(1, 1, S), (NH, S, S))

    for l in range(NUM_LAYERS):                                   # static loop, weights resident
        # -------- self attention: head-batched matmuls, no lane slicing / concat --------
        xb = jnp.broadcast_to(x, (3 * NH, S, H))                  # (3NH, S, H)
        qkv = jax.lax.dot_general(
            xb, wqkv_ref[l], (((2,), (1,)), ((0,), (0,))),
            preferred_element_type=jnp.float32) + bqkv_ref[l]     # (3NH, S, DH)
        qh, kh, vh = qkv[:NH], qkv[NH:2 * NH], qkv[2 * NH:]

        s_ = jax.lax.dot_general(qh, kh, (((2,), (2,)), ((0,), (0,))),
                                 preferred_element_type=jnp.float32)      # (NH, S, S)
        s_ = s_ * scale + mask_b
        s_ = s_ - jnp.max(s_, axis=-1, keepdims=True)
        p = jnp.exp(s_)
        p = p / jnp.sum(p, axis=-1, keepdims=True)                # exact softmax division

        ctx = jax.lax.dot_general(p, vh, (((2,), (1,)), ((0,), (0,))),
                                  preferred_element_type=jnp.float32)     # (NH, S, DH)
        attn = jax.lax.dot_general(ctx, wo_ref[l], (((2,), (1,)), ((0,), (0,))),
                                   preferred_element_type=jnp.float32)    # (NH, S, H)
        attn = jnp.sum(attn, axis=0) + bo_ref[l]                  # merge heads: cheap leading-dim sum
        h1 = _ln(x + attn, l1g_ref[l], l1b_ref[l])

        # -------- feed forward --------
        ff = _gelu(jnp.dot(h1, w1_ref[l], preferred_element_type=jnp.float32) + b1_ref[l])
        ff = jnp.dot(ff, w2_ref[l], preferred_element_type=jnp.float32) + b2_ref[l]
        x = _ln(h1 + ff, l2g_ref[l], l2b_ref[l])

    # Pooler + classifier on all S rows (8 rows, free at this size); wrapper takes row 0 ([CLS]).
    pooled = jnp.tanh(jnp.dot(x, wp_ref[...], preferred_element_type=jnp.float32) + bp_ref[...])
    logits = jnp.dot(pooled, wc_ref[...], preferred_element_type=jnp.float32) + bc_ref[...]  # (S, 128)
    o_ref[...] = logits.astype(o_ref.dtype)


# ----------------- one-time weight packing (outside jit) -----------------
def pack_params(params):
    H, NH, DH = HIDDEN, NUM_HEADS, HEAD_DIM

    def hm_w(w):      # (H, H) -> (NH, H, DH), head-major output columns
        return w.reshape(H, NH, DH).transpose(1, 0, 2)

    def hm_b(bvec):   # (1, H) -> (NH, 1, DH)
        return bvec.reshape(NH, 1, DH)

    wqkv, bqkv, wo, bo = [], [], [], []
    l1g, l1b, w1, b1, w2, b2, l2g, l2b = [], [], [], [], [], [], [], []
    for lp in params['layers']:
        wqkv.append(jnp.concatenate([hm_w(lp['wq']), hm_w(lp['wk']), hm_w(lp['wv'])], axis=0))
        bqkv.append(jnp.concatenate([hm_b(lp['bq']), hm_b(lp['bk']), hm_b(lp['bv'])], axis=0))
        wo.append(lp['wo'].reshape(NH, DH, H))      # input rows are head-major (n*DH + d)
        bo.append(lp['bo'])
        l1g.append(lp['ln1_g']); l1b.append(lp['ln1_b'])
        w1.append(lp['w1']); b1.append(lp['b1'])
        w2.append(lp['w2']); b2.append(lp['b2'])
        l2g.append(lp['ln2_g']); l2b.append(lp['ln2_b'])

    st = lambda xs: jnp.stack(xs, axis=0)
    C = params['cls_w'].shape[1]
    wc_pad = jnp.zeros((H, LANE_PAD), jnp.float32).at[:, :C].set(params['cls_w'])
    bc_pad = jnp.zeros((1, LANE_PAD), jnp.float32).at[:, :C].set(params['cls_b'])

    return {
        'word_emb': params['word_emb'].astype(jnp.float32),       # (VOCAB, H)
        'pos_emb': params['pos_emb'][:SEQ].astype(jnp.float32),   # (S, H)
        'type_emb': params['type_emb'][0:1].astype(jnp.float32),  # (1, H)  token_type_ids = 0
        'emb_ln_g': params['emb_ln_g'], 'emb_ln_b': params['emb_ln_b'],
        'wqkv': st(wqkv), 'bqkv': st(bqkv),                       # (L,3NH,H,DH), (L,3NH,1,DH)
        'wo': st(wo), 'bo': st(bo),                               # (L,NH,DH,H), (L,1,H)
        'ln1_g': st(l1g), 'ln1_b': st(l1b),
        'w1': st(w1), 'b1': st(b1), 'w2': st(w2), 'b2': st(b2),
        'ln2_g': st(l2g), 'ln2_b': st(l2b),
        'pooler_w': params['pooler_w'], 'pooler_b': params['pooler_b'],
        'cls_w': wc_pad, 'cls_b': bc_pad,                         # lane-padded to 128
    }


_WEIGHT_ORDER = ['word_emb', 'pos_emb', 'type_emb', 'emb_ln_g', 'emb_ln_b',
                 'wqkv', 'bqkv', 'wo', 'bo', 'ln1_g', 'ln1_b',
                 'w1', 'b1', 'w2', 'b2', 'ln2_g', 'ln2_b',
                 'pooler_w', 'pooler_b', 'cls_w', 'cls_b']


# ----------------- forward (jit-able; per-call glue is only the mask bias) -----------------
def transformer_classifier_forward(ids, mask, packed):
    B, S = ids.shape

    # HF-style additive padding bias along the key dimension: (B, 1, S)
    mask_bias = ((1.0 - mask.astype(jnp.float32)) * -10000.0).reshape(B, 1, S)

    weights = [packed[n] for n in _WEIGHT_ORDER]

    def const_spec(arr):
        nz = (0,) * arr.ndim
        return pl.BlockSpec(arr.shape, lambda b, ids_ref, _z=nz: _z)

    grid_spec = pltpu.PrefetchScalarGridSpec(
        num_scalar_prefetch=1,                         # ids -> SMEM, used for in-kernel gather
        grid=(B,),                                     # one program per batch element
        in_specs=[pl.BlockSpec((None, 1, S), lambda b, ids_ref: (b, 0, 0))]   # mask bias row b
                 + [const_spec(w) for w in weights],
        out_specs=pl.BlockSpec((None, S, LANE_PAD), lambda b, ids_ref: (b, 0, 0)),
        scratch_shapes=[pltpu.VMEM((S, HIDDEN), jnp.float32)],
    )

    out = pl.pallas_call(
        fused_bert_kernel,
        out_shape=jax.ShapeDtypeStruct((B, S, LANE_PAD), jnp.float32),
        grid_spec=grid_spec,
        compiler_params=pltpu.CompilerParams(dimension_semantics=("parallel",)),
    )(ids.astype(jnp.int32), mask_bias, *weights)

    # Row 0 is the [CLS] token; first NUM_CLASSES lanes are the real logits.
    return out[:, 0, :NUM_CLASSES]


# ----------------- parameter init (deterministic, synthetic) -----------------
def init_params(key):
    def nrm(k, shape, scale=0.02):
        return (scale * jax.random.normal(k, shape)).astype(jnp.float32)

    keys = jax.random.split(key, 8 + NUM_LAYERS)
    params = {
        'word_emb': nrm(keys[0], (VOCAB, HIDDEN)),
        'pos_emb': nrm(keys[1], (MAX_POS, HIDDEN)),
        'type_emb': nrm(keys[2], (TYPE_VOCAB, HIDDEN)),
        'emb_ln_g': jnp.ones((1, HIDDEN), jnp.float32),
        'emb_ln_b': jnp.zeros((1, HIDDEN), jnp.float32),
        'pooler_w': nrm(keys[3], (HIDDEN, HIDDEN)),
        'pooler_b': jnp.zeros((1, HIDDEN), jnp.float32),
        'cls_w': nrm(keys[4], (HIDDEN, NUM_CLASSES)),
        'cls_b': jnp.zeros((1, NUM_CLASSES), jnp.float32),
        'layers': [],
    }
    for li in range(NUM_LAYERS):
        lk = jax.random.split(keys[8 + li], 6)
        params['layers'].append({
            'wq': nrm(lk[0], (HIDDEN, HIDDEN)),
            'bq': jnp.zeros((1, HIDDEN), jnp.float32),
            'wk': nrm(lk[1], (HIDDEN, HIDDEN)),
            'bk': jnp.zeros((1, HIDDEN), jnp.float32),
            'wv': nrm(lk[2], (HIDDEN, HIDDEN)),
            'bv': jnp.zeros((1, HIDDEN), jnp.float32),
            'wo': nrm(lk[3], (HIDDEN, HIDDEN)),
            'bo': jnp.zeros((1, HIDDEN), jnp.float32),
            'ln1_g': jnp.ones((1, HIDDEN), jnp.float32),
            'ln1_b': jnp.zeros((1, HIDDEN), jnp.float32),
            'w1': nrm(lk[4], (HIDDEN, INTERMEDIATE)),
            'b1': jnp.zeros((1, INTERMEDIATE), jnp.float32),
            'w2': nrm(lk[5], (INTERMEDIATE, HIDDEN)),
            'b2': jnp.zeros((1, HIDDEN), jnp.float32),
            'ln2_g': jnp.ones((1, HIDDEN), jnp.float32),
            'ln2_b': jnp.zeros((1, HIDDEN), jnp.float32),
        })
    return params


if __name__ == "__main__":
    key = jax.random.PRNGKey(0)
    k_param, k_ids = jax.random.split(key)

    params = init_params(k_param)
    packed = pack_params(params)          # one-time packing, outside the jitted forward

    ids = jax.random.randint(k_ids, (BATCH, SEQ), 0, VOCAB, dtype=jnp.int32)
    # Attention mask: batch 0 is full-length, batch 1 has 2 padding positions.
    mask = jnp.array([[1, 1, 1, 1, 1, 1, 1, 1],
                      [1, 1, 1, 1, 1, 1, 0, 0]], dtype=jnp.int32)

    fwd = jax.jit(transformer_classifier_forward)
    logits = fwd(ids, mask, packed)
    jax.block_until_ready(logits)
    assert logits.shape == (BATCH, NUM_CLASSES)
    assert bool(jnp.all(jnp.isfinite(logits)))
    print("KERNEL_OK")
</pallas_src>

<mosaic_0001>
module attributes {stable_mosaic.version = 11 : i64} {
  func.func @fused_bert_kernel(%arg0: i32, %arg1: memref<2x8xi32, #tpu.memory_space<smem>>, %arg2: memref<1x1x8xf32, #tpu.memory_space<vmem>>, %arg3: memref<100x32xf32, #tpu.memory_space<vmem>>, %arg4: memref<8x32xf32, #tpu.memory_space<vmem>>, %arg5: memref<1x32xf32, #tpu.memory_space<vmem>>, %arg6: memref<1x32xf32, #tpu.memory_space<vmem>>, %arg7: memref<1x32xf32, #tpu.memory_space<vmem>>, %arg8: memref<2x6x32x16xf32, #tpu.memory_space<vmem>>, %arg9: memref<2x6x1x16xf32, #tpu.memory_space<vmem>>, %arg10: memref<2x2x16x32xf32, #tpu.memory_space<vmem>>, %arg11: memref<2x1x32xf32, #tpu.memory_space<vmem>>, %arg12: memref<2x1x32xf32, #tpu.memory_space<vmem>>, %arg13: memref<2x1x32xf32, #tpu.memory_space<vmem>>, %arg14: memref<2x32x64xf32, #tpu.memory_space<vmem>>, %arg15: memref<2x1x64xf32, #tpu.memory_space<vmem>>, %arg16: memref<2x64x32xf32, #tpu.memory_space<vmem>>, %arg17: memref<2x1x32xf32, #tpu.memory_space<vmem>>, %arg18: memref<2x1x32xf32, #tpu.memory_space<vmem>>, %arg19: memref<2x1x32xf32, #tpu.memory_space<vmem>>, %arg20: memref<32x32xf32, #tpu.memory_space<vmem>>, %arg21: memref<1x32xf32, #tpu.memory_space<vmem>>, %arg22: memref<32x128xf32, #tpu.memory_space<vmem>>, %arg23: memref<1x128xf32, #tpu.memory_space<vmem>>, %arg24: memref<1x8x128xf32, #tpu.memory_space<vmem>>, %arg25: memref<8x32xf32, #tpu.memory_space<vmem>>) attributes {dimension_semantics = [#tpu.dimension_semantics<parallel>], iteration_bounds = array<i64: 2>, scalar_prefetch = 1 : i64, scratch_operands = 1 : i64, tpu.core_type = #tpu.core_type<tc>, window_params = [{transform_indices = @transform_0, window_bounds = array<i64: 1, 1, 8>}, {pipeline_mode = #tpu.pipeline_mode<synchronous>, transform_indices = @transform_1, window_bounds = array<i64: 100, 32>}, {pipeline_mode = #tpu.pipeline_mode<synchronous>, transform_indices = @transform_2, window_bounds = array<i64: 8, 32>}, {pipeline_mode = #tpu.pipeline_mode<synchronous>, transform_indices = @transform_3, window_bounds = array<i64: 1, 32>}, {pipeline_mode = #tpu.pipeline_mode<synchronous>, transform_indices = @transform_4, window_bounds = array<i64: 1, 32>}, {pipeline_mode = #tpu.pipeline_mode<synchronous>, transform_indices = @transform_5, window_bounds = array<i64: 1, 32>}, {pipeline_mode = #tpu.pipeline_mode<synchronous>, transform_indices = @transform_6, window_bounds = array<i64: 2, 6, 32, 16>}, {pipeline_mode = #tpu.pipeline_mode<synchronous>, transform_indices = @transform_7, window_bounds = array<i64: 2, 6, 1, 16>}, {pipeline_mode = #tpu.pipeline_mode<synchronous>, transform_indices = @transform_8, window_bounds = array<i64: 2, 2, 16, 32>}, {pipeline_mode = #tpu.pipeline_mode<synchronous>, transform_indices = @transform_9, window_bounds = array<i64: 2, 1, 32>}, {pipeline_mode = #tpu.pipeline_mode<synchronous>, transform_indices = @transform_10, window_bounds = array<i64: 2, 1, 32>}, {pipeline_mode = #tpu.pipeline_mode<synchronous>, transform_indices = @transform_11, window_bounds = array<i64: 2, 1, 32>}, {pipeline_mode = #tpu.pipeline_mode<synchronous>, transform_indices = @transform_12, window_bounds = array<i64: 2, 32, 64>}, {pipeline_mode = #tpu.pipeline_mode<synchronous>, transform_indices = @transform_13, window_bounds = array<i64: 2, 1, 64>}, {pipeline_mode = #tpu.pipeline_mode<synchronous>, transform_indices = @transform_14, window_bounds = array<i64: 2, 64, 32>}, {pipeline_mode = #tpu.pipeline_mode<synchronous>, transform_indices = @transform_15, window_bounds = array<i64: 2, 1, 32>}, {pipeline_mode = #tpu.pipeline_mode<synchronous>, transform_indices = @transform_16, window_bounds = array<i64: 2, 1, 32>}, {pipeline_mode = #tpu.pipeline_mode<synchronous>, transform_indices = @transform_17, window_bounds = array<i64: 2, 1, 32>}, {pipeline_mode = #tpu.pipeline_mode<synchronous>, transform_indices = @transform_18, window_bounds = array<i64: 32, 32>}, {pipeline_mode = #tpu.pipeline_mode<synchronous>, transform_indices = @transform_19, window_bounds = array<i64: 1, 32>}, {pipeline_mode = #tpu.pipeline_mode<synchronous>, transform_indices = @transform_20, window_bounds = array<i64: 32, 128>}, {pipeline_mode = #tpu.pipeline_mode<synchronous>, transform_indices = @transform_21, window_bounds = array<i64: 1, 128>}, {transform_indices = @transform_22, window_bounds = array<i64: 1, 8, 128>}]} {
    %0 = arith.index_cast %arg0 : i32 to index
    %c0 = arith.constant 0 : index
    %1 = memref.load %arg1[%0, %c0] : memref<2x8xi32, #tpu.memory_space<smem>>
    %2 = arith.index_cast %1 : i32 to index
    %c0_0 = arith.constant 0 : index
    %3 = vector.load %arg3[%2, %c0_0] : memref<100x32xf32, #tpu.memory_space<vmem>>, vector<1x32xf32>
    %c0_1 = arith.constant 0 : index
    %c0_2 = arith.constant 0 : index
    %4 = vector.load %arg25[%c0_1, %c0_2] : memref<8x32xf32, #tpu.memory_space<vmem>>, vector<1x32xf32>
    tpu.vector_store %arg25[%c0_1, %c0_2], %3 {strides = array<i32>} : memref<8x32xf32, #tpu.memory_space<vmem>>, vector<1x32xf32>,
    %5 = arith.index_cast %arg0 : i32 to index
    %c1 = arith.constant 1 : index
    %6 = memref.load %arg1[%5, %c1] : memref<2x8xi32, #tpu.memory_space<smem>>
    %7 = arith.index_cast %6 : i32 to index
    %c0_3 = arith.constant 0 : index
    %8 = vector.load %arg3[%7, %c0_3] : memref<100x32xf32, #tpu.memory_space<vmem>>, vector<1x32xf32>
    %c1_4 = arith.constant 1 : index
    %c0_5 = arith.constant 0 : index
    %9 = vector.load %arg25[%c1_4, %c0_5] : memref<8x32xf32, #tpu.memory_space<vmem>>, vector<1x32xf32>
    tpu.vector_store %arg25[%c1_4, %c0_5], %8 {strides = array<i32>} : memref<8x32xf32, #tpu.memory_space<vmem>>, vector<1x32xf32>,
    %10 = arith.index_cast %arg0 : i32 to index
    %c2 = arith.constant 2 : index
    %11 = memref.load %arg1[%10, %c2] : memref<2x8xi32, #tpu.memory_space<smem>>
    %12 = arith.index_cast %11 : i32 to index
    %c0_6 = arith.constant 0 : index
    %13 = vector.load %arg3[%12, %c0_6] : memref<100x32xf32, #tpu.memory_space<vmem>>, vector<1x32xf32>
    %c2_7 = arith.constant 2 : index
    %c0_8 = arith.constant 0 : index
    %14 = vector.load %arg25[%c2_7, %c0_8] : memref<8x32xf32, #tpu.memory_space<vmem>>, vector<1x32xf32>
    tpu.vector_store %arg25[%c2_7, %c0_8], %13 {strides = array<i32>} : memref<8x32xf32, #tpu.memory_space<vmem>>, vector<1x32xf32>,
    %15 = arith.index_cast %arg0 : i32 to index
    %c3 = arith.constant 3 : index
    %16 = memref.load %arg1[%15, %c3] : memref<2x8xi32, #tpu.memory_space<smem>>
    %17 = arith.index_cast %16 : i32 to index
    %c0_9 = arith.constant 0 : index
    %18 = vector.load %arg3[%17, %c0_9] : memref<100x32xf32, #tpu.memory_space<vmem>>, vector<1x32xf32>
    %c3_10 = arith.constant 3 : index
    %c0_11 = arith.constant 0 : index
    %19 = vector.load %arg25[%c3_10, %c0_11] : memref<8x32xf32, #tpu.memory_space<vmem>>, vector<1x32xf32>
    tpu.vector_store %arg25[%c3_10, %c0_11], %18 {strides = array<i32>} : memref<8x32xf32, #tpu.memory_space<vmem>>, vector<1x32xf32>,
    %20 = arith.index_cast %arg0 : i32 to index
    %c4 = arith.constant 4 : index
    %21 = memref.load %arg1[%20, %c4] : memref<2x8xi32, #tpu.memory_space<smem>>
    %22 = arith.index_cast %21 : i32 to index
    %c0_12 = arith.constant 0 : index
    %23 = vector.load %arg3[%22, %c0_12] : memref<100x32xf32, #tpu.memory_space<vmem>>, vector<1x32xf32>
    %c4_13 = arith.constant 4 : index
    %c0_14 = arith.constant 0 : index
    %24 = vector.load %arg25[%c4_13, %c0_14] : memref<8x32xf32, #tpu.memory_space<vmem>>, vector<1x32xf32>
    tpu.vector_store %arg25[%c4_13, %c0_14], %23 {strides = array<i32>} : memref<8x32xf32, #tpu.memory_space<vmem>>, vector<1x32xf32>,
    %25 = arith.index_cast %arg0 : i32 to index
    %c5 = arith.constant 5 : index
    %26 = memref.load %arg1[%25, %c5] : memref<2x8xi32, #tpu.memory_space<smem>>
    %27 = arith.index_cast %26 : i32 to index
    %c0_15 = arith.constant 0 : index
    %28 = vector.load %arg3[%27, %c0_15] : memref<100x32xf32, #tpu.memory_space<vmem>>, vector<1x32xf32>
    %c5_16 = arith.constant 5 : index
    %c0_17 = arith.constant 0 : index
    %29 = vector.load %arg25[%c5_16, %c0_17] : memref<8x32xf32, #tpu.memory_space<vmem>>, vector<1x32xf32>
    tpu.vector_store %arg25[%c5_16, %c0_17], %28 {strides = array<i32>} : memref<8x32xf32, #tpu.memory_space<vmem>>, vector<1x32xf32>,
    %30 = arith.index_cast %arg0 : i32 to index
    %c6 = arith.constant 6 : index
    %31 = memref.load %arg1[%30, %c6] : memref<2x8xi32, #tpu.memory_space<smem>>
    %32 = arith.index_cast %31 : i32 to index
    %c0_18 = arith.constant 0 : index
    %33 = vector.load %arg3[%32, %c0_18] : memref<100x32xf32, #tpu.memory_space<vmem>>, vector<1x32xf32>
    %c6_19 = arith.constant 6 : index
    %c0_20 = arith.constant 0 : index
    %34 = vector.load %arg25[%c6_19, %c0_20] : memref<8x32xf32, #tpu.memory_space<vmem>>, vector<1x32xf32>
    tpu.vector_store %arg25[%c6_19, %c0_20], %33 {strides = array<i32>} : memref<8x32xf32, #tpu.memory_space<vmem>>, vector<1x32xf32>,
    %35 = arith.index_cast %arg0 : i32 to index
    %c7 = arith.constant 7 : index
    %36 = memref.load %arg1[%35, %c7] : memref<2x8xi32, #tpu.memory_space<smem>>
    %37 = arith.index_cast %36 : i32 to index
    %c0_21 = arith.constant 0 : index
    %38 = vector.load %arg3[%37, %c0_21] : memref<100x32xf32, #tpu.memory_space<vmem>>, vector<1x32xf32>
    %c7_22 = arith.constant 7 : index
    %c0_23 = arith.constant 0 : index
    %39 = vector.load %arg25[%c7_22, %c0_23] : memref<8x32xf32, #tpu.memory_space<vmem>>, vector<1x32xf32>
    tpu.vector_store %arg25[%c7_22, %c0_23], %38 {strides = array<i32>} : memref<8x32xf32, #tpu.memory_space<vmem>>, vector<1x32xf32>,
    %c0_24 = arith.constant 0 : index
    %c0_25 = arith.constant 0 : index
    %40 = vector.load %arg25[%c0_24, %c0_25] : memref<8x32xf32, #tpu.memory_space<vmem>>, vector<8x32xf32>
    %c0_26 = arith.constant 0 : index
    %c0_27 = arith.constant 0 : index
    %41 = vector.load %arg4[%c0_26, %c0_27] : memref<8x32xf32, #tpu.memory_space<vmem>>, vector<8x32xf32>
    %42 = arith.addf %40, %41 : vector<8x32xf32>
    %c0_28 = arith.constant 0 : index
    %c0_29 = arith.constant 0 : index
    %43 = vector.load %arg5[%c0_28, %c0_29] : memref<1x32xf32, #tpu.memory_space<vmem>>, vector<1x32xf32>
    %44 = vector.broadcast %43 : vector<1x32xf32> to vector<8x32xf32>
    %45 = arith.addf %42, %44 : vector<8x32xf32>
    %c0_30 = arith.constant 0 : index
    %c0_31 = arith.constant 0 : index
    %46 = vector.load %arg6[%c0_30, %c0_31] : memref<1x32xf32, #tpu.memory_space<vmem>>, vector<1x32xf32>
    %c0_32 = arith.constant 0 : index
    %c0_33 = arith.constant 0 : index
    %47 = vector.load %arg7[%c0_32, %c0_33] : memref<1x32xf32, #tpu.memory_space<vmem>>, vector<1x32xf32>
    %cst = arith.constant dense<0.000000e+00> : vector<8xf32>
    %48 = vector.multi_reduction <add>, %45, %cst [1] : vector<8x32xf32> to vector<8xf32>
    %49 = vector.shape_cast %48 : vector<8xf32> to vector<8x1xf32>
    %cst_34 = arith.constant 3.200000e+01 : f32
    %50 = vector.broadcast %cst_34 : f32 to vector<8x1xf32>
    %51 = arith.divf %49, %50 : vector<8x1xf32>
    %52 = vector.broadcast %51 : vector<8x1xf32> to vector<8x32xf32>
    %53 = arith.subf %45, %52 : vector<8x32xf32>
    %54 = arith.mulf %53, %53 : vector<8x32xf32>
    %cst_35 = arith.constant dense<0.000000e+00> : vector<8xf32>
    %55 = vector.multi_reduction <add>, %54, %cst_35 [1] : vector<8x32xf32> to vector<8xf32>
    %56 = vector.shape_cast %55 : vector<8xf32> to vector<8x1xf32>
    %cst_36 = arith.constant 3.200000e+01 : f32
    %57 = vector.broadcast %cst_36 : f32 to vector<8x1xf32>
    %58 = arith.divf %56, %57 : vector<8x1xf32>
    %59 = vector.broadcast %51 : vector<8x1xf32> to vector<8x32xf32>
    %60 = arith.subf %45, %59 : vector<8x32xf32>
    %cst_37 = arith.constant 9.99999996E-13 : f32
    %61 = vector.broadcast %cst_37 : f32 to vector<8x1xf32>
    %62 = arith.addf %58, %61 : vector<8x1xf32>
    %63 = math.rsqrt %62 : vector<8x1xf32>
    %64 = vector.broadcast %63 : vector<8x1xf32> to vector<8x32xf32>
    %65 = arith.mulf %60, %64 : vector<8x32xf32>
    %66 = vector.broadcast %46 : vector<1x32xf32> to vector<8x32xf32>
    %67 = arith.mulf %65, %66 : vector<8x32xf32>
    %68 = vector.broadcast %47 : vector<1x32xf32> to vector<8x32xf32>
    %69 = arith.addf %67, %68 : vector<8x32xf32>
    %c0_38 = arith.constant 0 : index
    %c0_39 = arith.constant 0 : index
    %c0_40 = arith.constant 0 : index
    %70 = vector.load %arg2[%c0_38, %c0_39, %c0_40] : memref<1x1x8xf32, #tpu.memory_space<vmem>>, vector<1x1x8xf32>
    %71 = vector.shape_cast %70 : vector<1x1x8xf32> to vector<1x8xf32>
    %72 = vector.shape_cast %71 : vector<1x8xf32> to vector<1x1x8xf32>
    %73 = vector.shape_cast %72 : vector<1x1x8xf32> to vector<1x1x8xf32>
    %74 = vector.broadcast %73 : vector<1x1x8xf32> to vector<2x8x8xf32>
    %75 = vector.shape_cast %69 : vector<8x32xf32> to vector<1x8x32xf32>
    %76 = vector.broadcast %75 : vector<1x8x32xf32> to vector<6x8x32xf32>
    %c0_41 = arith.constant 0 : index
    %c0_42 = arith.constant 0 : index
    %c0_43 = arith.constant 0 : index
    %c0_44 = arith.constant 0 : index
    %77 = vector.load %arg8[%c0_41, %c0_42, %c0_43, %c0_44] : memref<2x6x32x16xf32, #tpu.memory_space<vmem>>, vector<1x6x32x16xf32>
    %78 = vector.shape_cast %77 : vector<1x6x32x16xf32> to vector<6x32x16xf32>
    %cst_45 = arith.constant dense<0.000000e+00> : vector<6x8x16xf32>
    %79 = tpu.matmul %76, %78, %cst_45 {dimension_numbers = #tpu.dot_dimension_numbers<[2], [1], [1], [2], [0, 0, 0, 1, 1, 2], [0], [0]>} : vector<6x8x32xf32>, vector<6x32x16xf32>, vector<6x8x16xf32> -> vector<6x8x16xf32>
    %c0_46 = arith.constant 0 : index
    %c0_47 = arith.constant 0 : index
    %c0_48 = arith.constant 0 : index
    %c0_49 = arith.constant 0 : index
    %80 = vector.load %arg9[%c0_46, %c0_47, %c0_48, %c0_49] : memref<2x6x1x16xf32, #tpu.memory_space<vmem>>, vector<1x6x1x16xf32>
    %81 = vector.shape_cast %80 : vector<1x6x1x16xf32> to vector<6x1x16xf32>
    %82 = vector.broadcast %81 : vector<6x1x16xf32> to vector<6x8x16xf32>
    %83 = arith.addf %79, %82 : vector<6x8x16xf32>
    %84 = vector.extract_strided_slice %83 {offsets = [0, 0, 0], sizes = [2, 8, 16], strides = [1, 1, 1]} : vector<6x8x16xf32> to vector<2x8x16xf32>
    %85 = vector.extract_strided_slice %83 {offsets = [2, 0, 0], sizes = [2, 8, 16], strides = [1, 1, 1]} : vector<6x8x16xf32> to vector<2x8x16xf32>
    %86 = vector.extract_strided_slice %83 {offsets = [4, 0, 0], sizes = [2, 8, 16], strides = [1, 1, 1]} : vector<6x8x16xf32> to vector<2x8x16xf32>
    %cst_50 = arith.constant dense<0.000000e+00> : vector<2x8x8xf32>
    %87 = tpu.matmul %84, %85, %cst_50 {dimension_numbers = #tpu.dot_dimension_numbers<[2], [2], [1], [1], [0, 0, 0, 1, 1, 1], [0], [0]>} : vector<2x8x16xf32>, vector<2x8x16xf32>, vector<2x8x8xf32> -> vector<2x8x8xf32>
    %cst_51 = arith.constant 2.500000e-01 : f32
    %88 = vector.broadcast %cst_51 : f32 to vector<2x8x8xf32>
    %89 = arith.mulf %87, %88 : vector<2x8x8xf32>
    %90 = arith.addf %89, %74 : vector<2x8x8xf32>
    %cst_52 = arith.constant dense<0xFF800000> : vector<2x8xf32>
    %91 = vector.multi_reduction <maximumf>, %90, %cst_52 [2] : vector<2x8x8xf32> to vector<2x8xf32>
    %92 = vector.shape_cast %91 : vector<2x8xf32> to vector<2x8x1xf32>
    %93 = vector.broadcast %92 : vector<2x8x1xf32> to vector<2x8x8xf32>
    %94 = arith.subf %90, %93 : vector<2x8x8xf32>
    %95 = math.exp %94 : vector<2x8x8xf32>
    %cst_53 = arith.constant dense<0.000000e+00> : vector<2x8xf32>
    %96 = vector.multi_reduction <add>, %95, %cst_53 [2] : vector<2x8x8xf32> to vector<2x8xf32>
    %97 = vector.shape_cast %96 : vector<2x8xf32> to vector<2x8x1xf32>
    %98 = vector.broadcast %97 : vector<2x8x1xf32> to vector<2x8x8xf32>
    %99 = arith.divf %95, %98 : vector<2x8x8xf32>
    %cst_54 = arith.constant dense<0.000000e+00> : vector<2x8x16xf32>
    %100 = tpu.matmul %99, %86, %cst_54 {dimension_numbers = #tpu.dot_dimension_numbers<[2], [1], [1], [2], [0, 0, 0, 1, 1, 2], [0], [0]>} : vector<2x8x8xf32>, vector<2x8x16xf32>, vector<2x8x16xf32> -> vector<2x8x16xf32>
    %c0_55 = arith.constant 0 : index
    %c0_56 = arith.constant 0 : index
    %c0_57 = arith.constant 0 : index
    %c0_58 = arith.constant 0 : index
    %101 = vector.load %arg10[%c0_55, %c0_56, %c0_57, %c0_58] : memref<2x2x16x32xf32, #tpu.memory_space<vmem>>, vector<1x2x16x32xf32>
    %102 = vector.shape_cast %101 : vector<1x2x16x32xf32> to vector<2x16x32xf32>
    %cst_59 = arith.constant dense<0.000000e+00> : vector<2x8x32xf32>
    %103 = tpu.matmul %100, %102, %cst_59 {dimension_numbers = #tpu.dot_dimension_numbers<[2], [1], [1], [2], [0, 0, 0, 1, 1, 2], [0], [0]>} : vector<2x8x16xf32>, vector<2x16x32xf32>, vector<2x8x32xf32> -> vector<2x8x32xf32>
    %cst_60 = arith.constant dense<0.000000e+00> : vector<8x32xf32>
    %104 = vector.multi_reduction <add>, %103, %cst_60 [0] : vector<2x8x32xf32> to vector<8x32xf32>
    %c0_61 = arith.constant 0 : index
    %c0_62 = arith.constant 0 : index
    %c0_63 = arith.constant 0 : index
    %105 = vector.load %arg11[%c0_61, %c0_62, %c0_63] : memref<2x1x32xf32, #tpu.memory_space<vmem>>, vector<1x1x32xf32>
    %106 = vector.shape_cast %105 : vector<1x1x32xf32> to vector<1x32xf32>
    %107 = vector.broadcast %106 : vector<1x32xf32> to vector<8x32xf32>
    %108 = arith.addf %104, %107 : vector<8x32xf32>
    %109 = arith.addf %69, %108 : vector<8x32xf32>
    %c0_64 = arith.constant 0 : index
    %c0_65 = arith.constant 0 : index
    %c0_66 = arith.constant 0 : index
    %110 = vector.load %arg12[%c0_64, %c0_65, %c0_66] : memref<2x1x32xf32, #tpu.memory_space<vmem>>, vector<1x1x32xf32>
    %111 = vector.shape_cast %110 : vector<1x1x32xf32> to vector<1x32xf32>
    %c0_67 = arith.constant 0 : index
    %c0_68 = arith.constant 0 : index
    %c0_69 = arith.constant 0 : index
    %112 = vector.load %arg13[%c0_67, %c0_68, %c0_69] : memref<2x1x32xf32, #tpu.memory_space<vmem>>, vector<1x1x32xf32>
    %113 = vector.shape_cast %112 : vector<1x1x32xf32> to vector<1x32xf32>
    %cst_70 = arith.constant dense<0.000000e+00> : vector<8xf32>
    %114 = vector.multi_reduction <add>, %109, %cst_70 [1] : vector<8x32xf32> to vector<8xf32>
    %115 = vector.shape_cast %114 : vector<8xf32> to vector<8x1xf32>
    %cst_71 = arith.constant 3.200000e+01 : f32
    %116 = vector.broadcast %cst_71 : f32 to vector<8x1xf32>
    %117 = arith.divf %115, %116 : vector<8x1xf32>
    %118 = vector.broadcast %117 : vector<8x1xf32> to vector<8x32xf32>
    %119 = arith.subf %109, %118 : vector<8x32xf32>
    %120 = arith.mulf %119, %119 : vector<8x32xf32>
    %cst_72 = arith.constant dense<0.000000e+00> : vector<8xf32>
    %121 = vector.multi_reduction <add>, %120, %cst_72 [1] : vector<8x32xf32> to vector<8xf32>
    %122 = vector.shape_cast %121 : vector<8xf32> to vector<8x1xf32>
    %cst_73 = arith.constant 3.200000e+01 : f32
    %123 = vector.broadcast %cst_73 : f32 to vector<8x1xf32>
    %124 = arith.divf %122, %123 : vector<8x1xf32>
    %125 = vector.broadcast %117 : vector<8x1xf32> to vector<8x32xf32>
    %126 = arith.subf %109, %125 : vector<8x32xf32>
    %cst_74 = arith.constant 9.99999996E-13 : f32
    %127 = vector.broadcast %cst_74 : f32 to vector<8x1xf32>
    %128 = arith.addf %124, %127 : vector<8x1xf32>
    %129 = math.rsqrt %128 : vector<8x1xf32>
    %130 = vector.broadcast %129 : vector<8x1xf32> to vector<8x32xf32>
    %131 = arith.mulf %126, %130 : vector<8x32xf32>
    %132 = vector.broadcast %111 : vector<1x32xf32> to vector<8x32xf32>
    %133 = arith.mulf %131, %132 : vector<8x32xf32>
    %134 = vector.broadcast %113 : vector<1x32xf32> to vector<8x32xf32>
    %135 = arith.addf %133, %134 : vector<8x32xf32>
    %c0_75 = arith.constant 0 : index
    %c0_76 = arith.constant 0 : index
    %c0_77 = arith.constant 0 : index
    %136 = vector.load %arg14[%c0_75, %c0_76, %c0_77] : memref<2x32x64xf32, #tpu.memory_space<vmem>>, vector<1x32x64xf32>
    %137 = vector.shape_cast %136 : vector<1x32x64xf32> to vector<32x64xf32>
    %cst_78 = arith.constant dense<0.000000e+00> : vector<8x64xf32>
    %138 = tpu.matmul %135, %137, %cst_78 {dimension_numbers = #tpu.dot_dimension_numbers<[1], [0], [0], [1], [0, 0, 1, 1], [], []>} : vector<8x32xf32>, vector<32x64xf32>, vector<8x64xf32> -> vector<8x64xf32>
    %c0_79 = arith.constant 0 : index
    %c0_80 = arith.constant 0 : index
    %c0_81 = arith.constant 0 : index
    %139 = vector.load %arg15[%c0_79, %c0_80, %c0_81] : memref<2x1x64xf32, #tpu.memory_space<vmem>>, vector<1x1x64xf32>
    %140 = vector.shape_cast %139 : vector<1x1x64xf32> to vector<1x64xf32>
    %141 = vector.broadcast %140 : vector<1x64xf32> to vector<8x64xf32>
    %142 = arith.addf %138, %141 : vector<8x64xf32>
    %cst_82 = arith.constant 5.000000e-01 : f32
    %143 = vector.broadcast %cst_82 : f32 to vector<8x64xf32>
    %144 = arith.mulf %143, %142 : vector<8x64xf32>
    %cst_83 = arith.constant 4.471500e-02 : f32
    %145 = vector.broadcast %cst_83 : f32 to vector<8x64xf32>
    %146 = arith.mulf %145, %142 : vector<8x64xf32>
    %147 = arith.mulf %146, %142 : vector<8x64xf32>
    %148 = arith.mulf %147, %142 : vector<8x64xf32>
    %149 = arith.addf %142, %148 : vector<8x64xf32>
    %cst_84 = arith.constant 0.797884583 : f32
    %150 = vector.broadcast %cst_84 : f32 to vector<8x64xf32>
    %151 = arith.mulf %150, %149 : vector<8x64xf32>
    %152 = math.tanh %151 : vector<8x64xf32>
    %cst_85 = arith.constant 1.000000e+00 : f32
    %153 = vector.broadcast %cst_85 : f32 to vector<8x64xf32>
    %154 = arith.addf %153, %152 : vector<8x64xf32>
    %155 = arith.mulf %144, %154 : vector<8x64xf32>
    %c0_86 = arith.constant 0 : index
    %c0_87 = arith.constant 0 : index
    %c0_88 = arith.constant 0 : index
    %156 = vector.load %arg16[%c0_86, %c0_87, %c0_88] : memref<2x64x32xf32, #tpu.memory_space<vmem>>, vector<1x64x32xf32>
    %157 = vector.shape_cast %156 : vector<1x64x32xf32> to vector<64x32xf32>
    %cst_89 = arith.constant dense<0.000000e+00> : vector<8x32xf32>
    %158 = tpu.matmul %155, %157, %cst_89 {dimension_numbers = #tpu.dot_dimension_numbers<[1], [0], [0], [1], [0, 0, 1, 1], [], []>} : vector<8x64xf32>, vector<64x32xf32>, vector<8x32xf32> -> vector<8x32xf32>
    %c0_90 = arith.constant 0 : index
    %c0_91 = arith.constant 0 : index
    %c0_92 = arith.constant 0 : index
    %159 = vector.load %arg17[%c0_90, %c0_91, %c0_92] : memref<2x1x32xf32, #tpu.memory_space<vmem>>, vector<1x1x32xf32>
    %160 = vector.shape_cast %159 : vector<1x1x32xf32> to vector<1x32xf32>
    %161 = vector.broadcast %160 : vector<1x32xf32> to vector<8x32xf32>
    %162 = arith.addf %158, %161 : vector<8x32xf32>
    %163 = arith.addf %135, %162 : vector<8x32xf32>
    %c0_93 = arith.constant 0 : index
    %c0_94 = arith.constant 0 : index
    %c0_95 = arith.constant 0 : index
    %164 = vector.load %arg18[%c0_93, %c0_94, %c0_95] : memref<2x1x32xf32, #tpu.memory_space<vmem>>, vector<1x1x32xf32>
    %165 = vector.shape_cast %164 : vector<1x1x32xf32> to vector<1x32xf32>
    %c0_96 = arith.constant 0 : index
    %c0_97 = arith.constant 0 : index
    %c0_98 = arith.constant 0 : index
    %166 = vector.load %arg19[%c0_96, %c0_97, %c0_98] : memref<2x1x32xf32, #tpu.memory_space<vmem>>, vector<1x1x32xf32>
    %167 = vector.shape_cast %166 : vector<1x1x32xf32> to vector<1x32xf32>
    %cst_99 = arith.constant dense<0.000000e+00> : vector<8xf32>
    %168 = vector.multi_reduction <add>, %163, %cst_99 [1] : vector<8x32xf32> to vector<8xf32>
    %169 = vector.shape_cast %168 : vector<8xf32> to vector<8x1xf32>
    %cst_100 = arith.constant 3.200000e+01 : f32
    %170 = vector.broadcast %cst_100 : f32 to vector<8x1xf32>
    %171 = arith.divf %169, %170 : vector<8x1xf32>
    %172 = vector.broadcast %171 : vector<8x1xf32> to vector<8x32xf32>
    %173 = arith.subf %163, %172 : vector<8x32xf32>
    %174 = arith.mulf %173, %173 : vector<8x32xf32>
    %cst_101 = arith.constant dense<0.000000e+00> : vector<8xf32>
    %175 = vector.multi_reduction <add>, %174, %cst_101 [1] : vector<8x32xf32> to vector<8xf32>
    %176 = vector.shape_cast %175 : vector<8xf32> to vector<8x1xf32>
    %cst_102 = arith.constant 3.200000e+01 : f32
    %177 = vector.broadcast %cst_102 : f32 to vector<8x1xf32>
    %178 = arith.divf %176, %177 : vector<8x1xf32>
    %179 = vector.broadcast %171 : vector<8x1xf32> to vector<8x32xf32>
    %180 = arith.subf %163, %179 : vector<8x32xf32>
    %cst_103 = arith.constant 9.99999996E-13 : f32
    %181 = vector.broadcast %cst_103 : f32 to vector<8x1xf32>
    %182 = arith.addf %178, %181 : vector<8x1xf32>
    %183 = math.rsqrt %182 : vector<8x1xf32>
    %184 = vector.broadcast %183 : vector<8x1xf32> to vector<8x32xf32>
    %185 = arith.mulf %180, %184 : vector<8x32xf32>
    %186 = vector.broadcast %165 : vector<1x32xf32> to vector<8x32xf32>
    %187 = arith.mulf %185, %186 : vector<8x32xf32>
    %188 = vector.broadcast %167 : vector<1x32xf32> to vector<8x32xf32>
    %189 = arith.addf %187, %188 : vector<8x32xf32>
    %190 = vector.shape_cast %189 : vector<8x32xf32> to vector<1x8x32xf32>
    %191 = vector.broadcast %190 : vector<1x8x32xf32> to vector<6x8x32xf32>
    %c1_104 = arith.constant 1 : index
    %c0_105 = arith.constant 0 : index
    %c0_106 = arith.constant 0 : index
    %c0_107 = arith.constant 0 : index
    %192 = vector.load %arg8[%c1_104, %c0_105, %c0_106, %c0_107] : memref<2x6x32x16xf32, #tpu.memory_space<vmem>>, vector<1x6x32x16xf32>
    %193 = vector.shape_cast %192 : vector<1x6x32x16xf32> to vector<6x32x16xf32>
    %cst_108 = arith.constant dense<0.000000e+00> : vector<6x8x16xf32>
    %194 = tpu.matmul %191, %193, %cst_108 {dimension_numbers = #tpu.dot_dimension_numbers<[2], [1], [1], [2], [0, 0, 0, 1, 1, 2], [0], [0]>} : vector<6x8x32xf32>, vector<6x32x16xf32>, vector<6x8x16xf32> -> vector<6x8x16xf32>
    %c1_109 = arith.constant 1 : index
    %c0_110 = arith.constant 0 : index
    %c0_111 = arith.constant 0 : index
    %c0_112 = arith.constant 0 : index
    %195 = vector.load %arg9[%c1_109, %c0_110, %c0_111, %c0_112] : memref<2x6x1x16xf32, #tpu.memory_space<vmem>>, vector<1x6x1x16xf32>
    %196 = vector.shape_cast %195 : vector<1x6x1x16xf32> to vector<6x1x16xf32>
    %197 = vector.broadcast %196 : vector<6x1x16xf32> to vector<6x8x16xf32>
    %198 = arith.addf %194, %197 : vector<6x8x16xf32>
    %199 = vector.extract_strided_slice %198 {offsets = [0, 0, 0], sizes = [2, 8, 16], strides = [1, 1, 1]} : vector<6x8x16xf32> to vector<2x8x16xf32>
    %200 = vector.extract_strided_slice %198 {offsets = [2, 0, 0], sizes = [2, 8, 16], strides = [1, 1, 1]} : vector<6x8x16xf32> to vector<2x8x16xf32>
    %201 = vector.extract_strided_slice %198 {offsets = [4, 0, 0], sizes = [2, 8, 16], strides = [1, 1, 1]} : vector<6x8x16xf32> to vector<2x8x16xf32>
    %cst_113 = arith.constant dense<0.000000e+00> : vector<2x8x8xf32>
    %202 = tpu.matmul %199, %200, %cst_113 {dimension_numbers = #tpu.dot_dimension_numbers<[2], [2], [1], [1], [0, 0, 0, 1, 1, 1], [0], [0]>} : vector<2x8x16xf32>, vector<2x8x16xf32>, vector<2x8x8xf32> -> vector<2x8x8xf32>
    %cst_114 = arith.constant 2.500000e-01 : f32
    %203 = vector.broadcast %cst_114 : f32 to vector<2x8x8xf32>
    %204 = arith.mulf %202, %203 : vector<2x8x8xf32>
    %205 = arith.addf %204, %74 : vector<2x8x8xf32>
    %cst_115 = arith.constant dense<0xFF800000> : vector<2x8xf32>
    %206 = vector.multi_reduction <maximumf>, %205, %cst_115 [2] : vector<2x8x8xf32> to vector<2x8xf32>
    %207 = vector.shape_cast %206 : vector<2x8xf32> to vector<2x8x1xf32>
    %208 = vector.broadcast %207 : vector<2x8x1xf32> to vector<2x8x8xf32>
    %209 = arith.subf %205, %208 : vector<2x8x8xf32>
    %210 = math.exp %209 : vector<2x8x8xf32>
    %cst_116 = arith.constant dense<0.000000e+00> : vector<2x8xf32>
    %211 = vector.multi_reduction <add>, %210, %cst_116 [2] : vector<2x8x8xf32> to vector<2x8xf32>
    %212 = vector.shape_cast %211 : vector<2x8xf32> to vector<2x8x1xf32>
    %213 = vector.broadcast %212 : vector<2x8x1xf32> to vector<2x8x8xf32>
    %214 = arith.divf %210, %213 : vector<2x8x8xf32>
    %cst_117 = arith.constant dense<0.000000e+00> : vector<2x8x16xf32>
    %215 = tpu.matmul %214, %201, %cst_117 {dimension_numbers = #tpu.dot_dimension_numbers<[2], [1], [1], [2], [0, 0, 0, 1, 1, 2], [0], [0]>} : vector<2x8x8xf32>, vector<2x8x16xf32>, vector<2x8x16xf32> -> vector<2x8x16xf32>
    %c1_118 = arith.constant 1 : index
    %c0_119 = arith.constant 0 : index
    %c0_120 = arith.constant 0 : index
    %c0_121 = arith.constant 0 : index
    %216 = vector.load %arg10[%c1_118, %c0_119, %c0_120, %c0_121] : memref<2x2x16x32xf32, #tpu.memory_space<vmem>>, vector<1x2x16x32xf32>
    %217 = vector.shape_cast %216 : vector<1x2x16x32xf32> to vector<2x16x32xf32>
    %cst_122 = arith.constant dense<0.000000e+00> : vector<2x8x32xf32>
    %218 = tpu.matmul %215, %217, %cst_122 {dimension_numbers = #tpu.dot_dimension_numbers<[2], [1], [1], [2], [0, 0, 0, 1, 1, 2], [0], [0]>} : vector<2x8x16xf32>, vector<2x16x32xf32>, vector<2x8x32xf32> -> vector<2x8x32xf32>
    %cst_123 = arith.constant dense<0.000000e+00> : vector<8x32xf32>
    %219 = vector.multi_reduction <add>, %218, %cst_123 [0] : vector<2x8x32xf32> to vector<8x32xf32>
    %c1_124 = arith.constant 1 : index
    %c0_125 = arith.constant 0 : index
    %c0_126 = arith.constant 0 : index
    %220 = vector.load %arg11[%c1_124, %c0_125, %c0_126] : memref<2x1x32xf32, #tpu.memory_space<vmem>>, vector<1x1x32xf32>
    %221 = vector.shape_cast %220 : vector<1x1x32xf32> to vector<1x32xf32>
    %222 = vector.broadcast %221 : vector<1x32xf32> to vector<8x32xf32>
    %223 = arith.addf %219, %222 : vector<8x32xf32>
    %224 = arith.addf %189, %223 : vector<8x32xf32>
    %c1_127 = arith.constant 1 : index
    %c0_128 = arith.constant 0 : index
    %c0_129 = arith.constant 0 : index
    %225 = vector.load %arg12[%c1_127, %c0_128, %c0_129] : memref<2x1x32xf32, #tpu.memory_space<vmem>>, vector<1x1x32xf32>
    %226 = vector.shape_cast %225 : vector<1x1x32xf32> to vector<1x32xf32>
    %c1_130 = arith.constant 1 : index
    %c0_131 = arith.constant 0 : index
    %c0_132 = arith.constant 0 : index
    %227 = vector.load %arg13[%c1_130, %c0_131, %c0_132] : memref<2x1x32xf32, #tpu.memory_space<vmem>>, vector<1x1x32xf32>
    %228 = vector.shape_cast %227 : vector<1x1x32xf32> to vector<1x32xf32>
    %cst_133 = arith.constant dense<0.000000e+00> : vector<8xf32>
    %229 = vector.multi_reduction <add>, %224, %cst_133 [1] : vector<8x32xf32> to vector<8xf32>
    %230 = vector.shape_cast %229 : vector<8xf32> to vector<8x1xf32>
    %cst_134 = arith.constant 3.200000e+01 : f32
    %231 = vector.broadcast %cst_134 : f32 to vector<8x1xf32>
    %232 = arith.divf %230, %231 : vector<8x1xf32>
    %233 = vector.broadcast %232 : vector<8x1xf32> to vector<8x32xf32>
    %234 = arith.subf %224, %233 : vector<8x32xf32>
    %235 = arith.mulf %234, %234 : vector<8x32xf32>
    %cst_135 = arith.constant dense<0.000000e+00> : vector<8xf32>
    %236 = vector.multi_reduction <add>, %235, %cst_135 [1] : vector<8x32xf32> to vector<8xf32>
    %237 = vector.shape_cast %236 : vector<8xf32> to vector<8x1xf32>
    %cst_136 = arith.constant 3.200000e+01 : f32
    %238 = vector.broadcast %cst_136 : f32 to vector<8x1xf32>
    %239 = arith.divf %237, %238 : vector<8x1xf32>
    %240 = vector.broadcast %232 : vector<8x1xf32> to vector<8x32xf32>
    %241 = arith.subf %224, %240 : vector<8x32xf32>
    %cst_137 = arith.constant 9.99999996E-13 : f32
    %242 = vector.broadcast %cst_137 : f32 to vector<8x1xf32>
    %243 = arith.addf %239, %242 : vector<8x1xf32>
    %244 = math.rsqrt %243 : vector<8x1xf32>
    %245 = vector.broadcast %244 : vector<8x1xf32> to vector<8x32xf32>
    %246 = arith.mulf %241, %245 : vector<8x32xf32>
    %247 = vector.broadcast %226 : vector<1x32xf32> to vector<8x32xf32>
    %248 = arith.mulf %246, %247 : vector<8x32xf32>
    %249 = vector.broadcast %228 : vector<1x32xf32> to vector<8x32xf32>
    %250 = arith.addf %248, %249 : vector<8x32xf32>
    %c1_138 = arith.constant 1 : index
    %c0_139 = arith.constant 0 : index
    %c0_140 = arith.constant 0 : index
    %251 = vector.load %arg14[%c1_138, %c0_139, %c0_140] : memref<2x32x64xf32, #tpu.memory_space<vmem>>, vector<1x32x64xf32>
    %252 = vector.shape_cast %251 : vector<1x32x64xf32> to vector<32x64xf32>
    %cst_141 = arith.constant dense<0.000000e+00> : vector<8x64xf32>
    %253 = tpu.matmul %250, %252, %cst_141 {dimension_numbers = #tpu.dot_dimension_numbers<[1], [0], [0], [1], [0, 0, 1, 1], [], []>} : vector<8x32xf32>, vector<32x64xf32>, vector<8x64xf32> -> vector<8x64xf32>
    %c1_142 = arith.constant 1 : index
    %c0_143 = arith.constant 0 : index
    %c0_144 = arith.constant 0 : index
    %254 = vector.load %arg15[%c1_142, %c0_143, %c0_144] : memref<2x1x64xf32, #tpu.memory_space<vmem>>, vector<1x1x64xf32>
    %255 = vector.shape_cast %254 : vector<1x1x64xf32> to vector<1x64xf32>
    %256 = vector.broadcast %255 : vector<1x64xf32> to vector<8x64xf32>
    %257 = arith.addf %253, %256 : vector<8x64xf32>
    %cst_145 = arith.constant 5.000000e-01 : f32
    %258 = vector.broadcast %cst_145 : f32 to vector<8x64xf32>
    %259 = arith.mulf %258, %257 : vector<8x64xf32>
    %cst_146 = arith.constant 4.471500e-02 : f32
    %260 = vector.broadcast %cst_146 : f32 to vector<8x64xf32>
    %261 = arith.mulf %260, %257 : vector<8x64xf32>
    %262 = arith.mulf %261, %257 : vector<8x64xf32>
    %263 = arith.mulf %262, %257 : vector<8x64xf32>
    %264 = arith.addf %257, %263 : vector<8x64xf32>
    %cst_147 = arith.constant 0.797884583 : f32
    %265 = vector.broadcast %cst_147 : f32 to vector<8x64xf32>
    %266 = arith.mulf %265, %264 : vector<8x64xf32>
    %267 = math.tanh %266 : vector<8x64xf32>
    %cst_148 = arith.constant 1.000000e+00 : f32
    %268 = vector.broadcast %cst_148 : f32 to vector<8x64xf32>
    %269 = arith.addf %268, %267 : vector<8x64xf32>
    %270 = arith.mulf %259, %269 : vector<8x64xf32>
    %c1_149 = arith.constant 1 : index
    %c0_150 = arith.constant 0 : index
    %c0_151 = arith.constant 0 : index
    %271 = vector.load %arg16[%c1_149, %c0_150, %c0_151] : memref<2x64x32xf32, #tpu.memory_space<vmem>>, vector<1x64x32xf32>
    %272 = vector.shape_cast %271 : vector<1x64x32xf32> to vector<64x32xf32>
    %cst_152 = arith.constant dense<0.000000e+00> : vector<8x32xf32>
    %273 = tpu.matmul %270, %272, %cst_152 {dimension_numbers = #tpu.dot_dimension_numbers<[1], [0], [0], [1], [0, 0, 1, 1], [], []>} : vector<8x64xf32>, vector<64x32xf32>, vector<8x32xf32> -> vector<8x32xf32>
    %c1_153 = arith.constant 1 : index
    %c0_154 = arith.constant 0 : index
    %c0_155 = arith.constant 0 : index
    %274 = vector.load %arg17[%c1_153, %c0_154, %c0_155] : memref<2x1x32xf32, #tpu.memory_space<vmem>>, vector<1x1x32xf32>
    %275 = vector.shape_cast %274 : vector<1x1x32xf32> to vector<1x32xf32>
    %276 = vector.broadcast %275 : vector<1x32xf32> to vector<8x32xf32>
    %277 = arith.addf %273, %276 : vector<8x32xf32>
    %278 = arith.addf %250, %277 : vector<8x32xf32>
    %c1_156 = arith.constant 1 : index
    %c0_157 = arith.constant 0 : index
    %c0_158 = arith.constant 0 : index
    %279 = vector.load %arg18[%c1_156, %c0_157, %c0_158] : memref<2x1x32xf32, #tpu.memory_space<vmem>>, vector<1x1x32xf32>
    %280 = vector.shape_cast %279 : vector<1x1x32xf32> to vector<1x32xf32>
    %c1_159 = arith.constant 1 : index
    %c0_160 = arith.constant 0 : index
    %c0_161 = arith.constant 0 : index
    %281 = vector.load %arg19[%c1_159, %c0_160, %c0_161] : memref<2x1x32xf32, #tpu.memory_space<vmem>>, vector<1x1x32xf32>
    %282 = vector.shape_cast %281 : vector<1x1x32xf32> to vector<1x32xf32>
    %cst_162 = arith.constant dense<0.000000e+00> : vector<8xf32>
    %283 = vector.multi_reduction <add>, %278, %cst_162 [1] : vector<8x32xf32> to vector<8xf32>
    %284 = vector.shape_cast %283 : vector<8xf32> to vector<8x1xf32>
    %cst_163 = arith.constant 3.200000e+01 : f32
    %285 = vector.broadcast %cst_163 : f32 to vector<8x1xf32>
    %286 = arith.divf %284, %285 : vector<8x1xf32>
    %287 = vector.broadcast %286 : vector<8x1xf32> to vector<8x32xf32>
    %288 = arith.subf %278, %287 : vector<8x32xf32>
    %289 = arith.mulf %288, %288 : vector<8x32xf32>
    %cst_164 = arith.constant dense<0.000000e+00> : vector<8xf32>
    %290 = vector.multi_reduction <add>, %289, %cst_164 [1] : vector<8x32xf32> to vector<8xf32>
    %291 = vector.shape_cast %290 : vector<8xf32> to vector<8x1xf32>
    %cst_165 = arith.constant 3.200000e+01 : f32
    %292 = vector.broadcast %cst_165 : f32 to vector<8x1xf32>
    %293 = arith.divf %291, %292 : vector<8x1xf32>
    %294 = vector.broadcast %286 : vector<8x1xf32> to vector<8x32xf32>
    %295 = arith.subf %278, %294 : vector<8x32xf32>
    %cst_166 = arith.constant 9.99999996E-13 : f32
    %296 = vector.broadcast %cst_166 : f32 to vector<8x1xf32>
    %297 = arith.addf %293, %296 : vector<8x1xf32>
    %298 = math.rsqrt %297 : vector<8x1xf32>
    %299 = vector.broadcast %298 : vector<8x1xf32> to vector<8x32xf32>
    %300 = arith.mulf %295, %299 : vector<8x32xf32>
    %301 = vector.broadcast %280 : vector<1x32xf32> to vector<8x32xf32>
    %302 = arith.mulf %300, %301 : vector<8x32xf32>
    %303 = vector.broadcast %282 : vector<1x32xf32> to vector<8x32xf32>
    %304 = arith.addf %302, %303 : vector<8x32xf32>
    %c0_167 = arith.constant 0 : index
    %c0_168 = arith.constant 0 : index
    %305 = vector.load %arg20[%c0_167, %c0_168] : memref<32x32xf32, #tpu.memory_space<vmem>>, vector<32x32xf32>
    %cst_169 = arith.constant dense<0.000000e+00> : vector<8x32xf32>
    %306 = tpu.matmul %304, %305, %cst_169 {dimension_numbers = #tpu.dot_dimension_numbers<[1], [0], [0], [1], [0, 0, 1, 1], [], []>} : vector<8x32xf32>, vector<32x32xf32>, vector<8x32xf32> -> vector<8x32xf32>
    %c0_170 = arith.constant 0 : index
    %c0_171 = arith.constant 0 : index
    %307 = vector.load %arg21[%c0_170, %c0_171] : memref<1x32xf32, #tpu.memory_space<vmem>>, vector<1x32xf32>
    %308 = vector.broadcast %307 : vector<1x32xf32> to vector<8x32xf32>
    %309 = arith.addf %306, %308 : vector<8x32xf32>
    %310 = math.tanh %309 : vector<8x32xf32>
    %c0_172 = arith.constant 0 : index
    %c0_173 = arith.constant 0 : index
    %311 = vector.load %arg22[%c0_172, %c0_173] : memref<32x128xf32, #tpu.memory_space<vmem>>, vector<32x128xf32>
    %cst_174 = arith.constant dense<0.000000e+00> : vector<8x128xf32>
    %312 = tpu.matmul %310, %311, %cst_174 {dimension_numbers = #tpu.dot_dimension_numbers<[1], [0], [0], [1], [0, 0, 1, 1], [], []>} : vector<8x32xf32>, vector<32x128xf32>, vector<8x128xf32> -> vector<8x128xf32>
    %c0_175 = arith.constant 0 : index
    %c0_176 = arith.constant 0 : index
    %313 = vector.load %arg23[%c0_175, %c0_176] : memref<1x128xf32, #tpu.memory_space<vmem>>, vector<1x128xf32>
    %314 = vector.broadcast %313 : vector<1x128xf32> to vector<8x128xf32>
    %315 = arith.addf %312, %314 : vector<8x128xf32>
    %c0_177 = arith.constant 0 : index
    %c0_178 = arith.constant 0 : index
    %c0_179 = arith.constant 0 : index
    %316 = vector.load %arg24[%c0_177, %c0_178, %c0_179] : memref<1x8x128xf32, #tpu.memory_space<vmem>>, vector<1x8x128xf32>
    %317 = vector.shape_cast %316 : vector<1x8x128xf32> to vector<8x128xf32>
    %318 = vector.shape_cast %315 : vector<8x128xf32> to vector<1x8x128xf32>
    tpu.vector_store %arg24[%c0_177, %c0_178, %c0_179], %318 {strides = array<i32>} : memref<1x8x128xf32, #tpu.memory_space<vmem>>, vector<1x8x128xf32>,
    return
  }
  func.func @transform_0(%arg0: i32, %arg1: memref<2x8xi32, #tpu.memory_space<smem>>) -> (i32, i32, i32) {
    %c0_i32 = arith.constant 0 : i32
    %c0_i32_0 = arith.constant 0 : i32
    %c0_i32_1 = arith.constant 0 : i32
    return %arg0, %c0_i32, %c0_i32_0 : i32, i32, i32
  }
  func.func @transform_1(%arg0: i32, %arg1: memref<2x8xi32, #tpu.memory_space<smem>>) -> (i32, i32) {
    %c0_i32 = arith.constant 0 : i32
    %c0_i32_0 = arith.constant 0 : i32
    %c0_i32_1 = arith.constant 0 : i32
    return %c0_i32, %c0_i32_0 : i32, i32
  }
  func.func @transform_2(%arg0: i32, %arg1: memref<2x8xi32, #tpu.memory_space<smem>>) -> (i32, i32) {
    %c0_i32 = arith.constant 0 : i32
    %c0_i32_0 = arith.constant 0 : i32
    %c0_i32_1 = arith.constant 0 : i32
    return %c0_i32, %c0_i32_0 : i32, i32
  }
  func.func @transform_3(%arg0: i32, %arg1: memref<2x8xi32, #tpu.memory_space<smem>>) -> (i32, i32) {
    %c0_i32 = arith.constant 0 : i32
    %c0_i32_0 = arith.constant 0 : i32
    %c0_i32_1 = arith.constant 0 : i32
    return %c0_i32, %c0_i32_0 : i32, i32
  }
  func.func @transform_4(%arg0: i32, %arg1: memref<2x8xi32, #tpu.memory_space<smem>>) -> (i32, i32) {
    %c0_i32 = arith.constant 0 : i32
    %c0_i32_0 = arith.constant 0 : i32
    %c0_i32_1 = arith.constant 0 : i32
    return %c0_i32, %c0_i32_0 : i32, i32
  }
  func.func @transform_5(%arg0: i32, %arg1: memref<2x8xi32, #tpu.memory_space<smem>>) -> (i32, i32) {
    %c0_i32 = arith.constant 0 : i32
    %c0_i32_0 = arith.constant 0 : i32
    %c0_i32_1 = arith.constant 0 : i32
    return %c0_i32, %c0_i32_0 : i32, i32
  }
  func.func @transform_6(%arg0: i32, %arg1: memref<2x8xi32, #tpu.memory_space<smem>>) -> (i32, i32, i32, i32) {
    %c0_i32 = arith.constant 0 : i32
    %c0_i32_0 = arith.constant 0 : i32
    %c0_i32_1 = arith.constant 0 : i32
    %c0_i32_2 = arith.constant 0 : i32
    %c0_i32_3 = arith.constant 0 : i32
    return %c0_i32, %c0_i32_0, %c0_i32_1, %c0_i32_2 : i32, i32, i32, i32
  }
  func.func @transform_7(%arg0: i32, %arg1: memref<2x8xi32, #tpu.memory_space<smem>>) -> (i32, i32, i32, i32) {
    %c0_i32 = arith.constant 0 : i32
    %c0_i32_0 = arith.constant 0 : i32
    %c0_i32_1 = arith.constant 0 : i32
    %c0_i32_2 = arith.constant 0 : i32
    %c0_i32_3 = arith.constant 0 : i32
    return %c0_i32, %c0_i32_0, %c0_i32_1, %c0_i32_2 : i32, i32, i32, i32
  }
  func.func @transform_8(%arg0: i32, %arg1: memref<2x8xi32, #tpu.memory_space<smem>>) -> (i32, i32, i32, i32) {
    %c0_i32 = arith.constant 0 : i32
    %c0_i32_0 = arith.constant 0 : i32
    %c0_i32_1 = arith.constant 0 : i32
    %c0_i32_2 = arith.constant 0 : i32
    %c0_i32_3 = arith.constant 0 : i32
    return %c0_i32, %c0_i32_0, %c0_i32_1, %c0_i32_2 : i32, i32, i32, i32
  }
  func.func @transform_9(%arg0: i32, %arg1: memref<2x8xi32, #tpu.memory_space<smem>>) -> (i32, i32, i32) {
    %c0_i32 = arith.constant 0 : i32
    %c0_i32_0 = arith.constant 0 : i32
    %c0_i32_1 = arith.constant 0 : i32
    %c0_i32_2 = arith.constant 0 : i32
    return %c0_i32, %c0_i32_0, %c0_i32_1 : i32, i32, i32
  }
  func.func @transform_10(%arg0: i32, %arg1: memref<2x8xi32, #tpu.memory_space<smem>>) -> (i32, i32, i32) {
    %c0_i32 = arith.constant 0 : i32
    %c0_i32_0 = arith.constant 0 : i32
    %c0_i32_1 = arith.constant 0 : i32
    %c0_i32_2 = arith.constant 0 : i32
    return %c0_i32, %c0_i32_0, %c0_i32_1 : i32, i32, i32
  }
  func.func @transform_11(%arg0: i32, %arg1: memref<2x8xi32, #tpu.memory_space<smem>>) -> (i32, i32, i32) {
    %c0_i32 = arith.constant 0 : i32
    %c0_i32_0 = arith.constant 0 : i32
    %c0_i32_1 = arith.constant 0 : i32
    %c0_i32_2 = arith.constant 0 : i32
    return %c0_i32, %c0_i32_0, %c0_i32_1 : i32, i32, i32
  }
  func.func @transform_12(%arg0: i32, %arg1: memref<2x8xi32, #tpu.memory_space<smem>>) -> (i32, i32, i32) {
    %c0_i32 = arith.constant 0 : i32
    %c0_i32_0 = arith.constant 0 : i32
    %c0_i32_1 = arith.constant 0 : i32
    %c0_i32_2 = arith.constant 0 : i32
    return %c0_i32, %c0_i32_0, %c0_i32_1 : i32, i32, i32
  }
  func.func @transform_13(%arg0: i32, %arg1: memref<2x8xi32, #tpu.memory_space<smem>>) -> (i32, i32, i32) {
    %c0_i32 = arith.constant 0 : i32
    %c0_i32_0 = arith.constant 0 : i32
    %c0_i32_1 = arith.constant 0 : i32
    %c0_i32_2 = arith.constant 0 : i32
    return %c0_i32, %c0_i32_0, %c0_i32_1 : i32, i32, i32
  }
  func.func @transform_14(%arg0: i32, %arg1: memref<2x8xi32, #tpu.memory_space<smem>>) -> (i32, i32, i32) {
    %c0_i32 = arith.constant 0 : i32
    %c0_i32_0 = arith.constant 0 : i32
    %c0_i32_1 = arith.constant 0 : i32
    %c0_i32_2 = arith.constant 0 : i32
    return %c0_i32, %c0_i32_0, %c0_i32_1 : i32, i32, i32
  }
  func.func @transform_15(%arg0: i32, %arg1: memref<2x8xi32, #tpu.memory_space<smem>>) -> (i32, i32, i32) {
    %c0_i32 = arith.constant 0 : i32
    %c0_i32_0 = arith.constant 0 : i32
    %c0_i32_1 = arith.constant 0 : i32
    %c0_i32_2 = arith.constant 0 : i32
    return %c0_i32, %c0_i32_0, %c0_i32_1 : i32, i32, i32
  }
  func.func @transform_16(%arg0: i32, %arg1: memref<2x8xi32, #tpu.memory_space<smem>>) -> (i32, i32, i32) {
    %c0_i32 = arith.constant 0 : i32
    %c0_i32_0 = arith.constant 0 : i32
    %c0_i32_1 = arith.constant 0 : i32
    %c0_i32_2 = arith.constant 0 : i32
    return %c0_i32, %c0_i32_0, %c0_i32_1 : i32, i32, i32
  }
  func.func @transform_17(%arg0: i32, %arg1: memref<2x8xi32, #tpu.memory_space<smem>>) -> (i32, i32, i32) {
    %c0_i32 = arith.constant 0 : i32
    %c0_i32_0 = arith.constant 0 : i32
    %c0_i32_1 = arith.constant 0 : i32
    %c0_i32_2 = arith.constant 0 : i32
    return %c0_i32, %c0_i32_0, %c0_i32_1 : i32, i32, i32
  }
  func.func @transform_18(%arg0: i32, %arg1: memref<2x8xi32, #tpu.memory_space<smem>>) -> (i32, i32) {
    %c0_i32 = arith.constant 0 : i32
    %c0_i32_0 = arith.constant 0 : i32
    %c0_i32_1 = arith.constant 0 : i32
    return %c0_i32, %c0_i32_0 : i32, i32
  }
  func.func @transform_19(%arg0: i32, %arg1: memref<2x8xi32, #tpu.memory_space<smem>>) -> (i32, i32) {
    %c0_i32 = arith.constant 0 : i32
    %c0_i32_0 = arith.constant 0 : i32
    %c0_i32_1 = arith.constant 0 : i32
    return %c0_i32, %c0_i32_0 : i32, i32
  }
  func.func @transform_20(%arg0: i32, %arg1: memref<2x8xi32, #tpu.memory_space<smem>>) -> (i32, i32) {
    %c0_i32 = arith.constant 0 : i32
    %c0_i32_0 = arith.constant 0 : i32
    %c0_i32_1 = arith.constant 0 : i32
    return %c0_i32, %c0_i32_0 : i32, i32
  }
  func.func @transform_21(%arg0: i32, %arg1: memref<2x8xi32, #tpu.memory_space<smem>>) -> (i32, i32) {
    %c0_i32 = arith.constant 0 : i32
    %c0_i32_0 = arith.constant 0 : i32
    %c0_i32_1 = arith.constant 0 : i32
    return %c0_i32, %c0_i32_0 : i32, i32
  }
  func.func @transform_22(%arg0: i32, %arg1: memref<2x8xi32, #tpu.memory_space<smem>>) -> (i32, i32, i32) {
    %c0_i32 = arith.constant 0 : i32
    %c0_i32_0 = arith.constant 0 : i32
    %c0_i32_1 = arith.constant 0 : i32
    return %arg0, %c0_i32, %c0_i32_0 : i32, i32, i32
  }
}

</mosaic_0001>

<bundles_post_ra>
// kernel: transformer_classifier_forward.1
= control target key start
LH: loop header
LB: loop body
LE: loop exit
PB: predicated region body
PF: predicated region fallthrough
CT: control target
= control target key end

     0   :  { %s4827_s0 = inlined_call_operand.vmem [shape: s32[2,8], index: 0, kind: input, shape index: {}]   ;;  %s4828_s1 = inlined_call_operand.vmem [shape: f32[2,1,8], index: 1, kind: input, shape index: {}]   ;;  %s4829_s2 = inlined_call_operand.vmem [shape: f32[100,32], index: 2, kind: input, shape index: {}]   ;;  %s4830_s3 = inlined_call_operand.vmem [shape: f32[8,32], index: 3, kind: input, shape index: {}]   ;;  %s4831_s4 = inlined_call_operand.vmem [shape: f32[1,32], index: 4, kind: input, shape index: {}]   ;;  %s4832_s5 = inlined_call_operand.vmem [shape: f32[1,32], index: 5, kind: input, shape index: {}]   ;;  %s4833_s6 = inlined_call_operand.vmem [shape: f32[1,32], index: 6, kind: input, shape index: {}]   ;;  %s4834_s7 = inlined_call_operand.vmem [shape: f32[2,6,32,16], index: 7, kind: input, shape index: {}]   ;;  %s4835_s8 = inlined_call_operand.vmem [shape: f32[2,6,1,16], index: 8, kind: input, shape index: {}]   ;;  %s4836_s9 = inlined_call_operand.vmem [shape: f32[2,2,16,32], index: 9, kind: input, shape index: {}]   ;;  %s4837_s10 = inlined_call_operand.vmem [shape: f32[2,1,32], index: 10, kind: input, shape index: {}]   ;;  %s4838_s11 = inlined_call_operand.vmem [shape: f32[2,1,32], index: 11, kind: input, shape index: {}]   ;;  %s4839_s12 = inlined_call_operand.vmem [shape: f32[2,1,32], index: 12, kind: input, shape index: {}]   ;;  %s4840_s13 = inlined_call_operand.vmem [shape: f32[2,32,64], index: 13, kind: input, shape index: {}]   ;;  %s4841_s14 = inlined_call_operand.vmem [shape: f32[2,1,64], index: 14, kind: input, shape index: {}]   ;;  %s4842_s15 = inlined_call_operand.vmem [shape: f32[2,64,32], index: 15, kind: input, shape index: {}]   ;;  %s4843_s16 = inlined_call_operand.vmem [shape: f32[2,1,32], index: 16, kind: input, shape index: {}]   ;;  %s4844_s17 = inlined_call_operand.vmem [shape: f32[2,1,32], index: 17, kind: input, shape index: {}]   ;;  %s4845_s18 = inlined_call_operand.vmem [shape: f32[2,1,32], index: 18, kind: input, shape index: {}]   ;;  %s4846_s19 = inlined_call_operand.vmem [shape: f32[32,32], index: 19, kind: input, shape index: {}]   ;;  %s4847_s20 = inlined_call_operand.vmem [shape: f32[1,32], index: 20, kind: input, shape index: {}]   ;;  %s4848_s21 = inlined_call_operand.vmem [shape: f32[32,128], index: 21, kind: input, shape index: {}]   ;;  %s4849_s22 = inlined_call_operand.vmem [shape: f32[1,128], index: 22, kind: input, shape index: {}]   ;;  %s4850_s23 = inlined_call_operand.vmem [shape: f32[2,8,128], index: 23, kind: output, shape index: {}]  }
   0x1   :  { %4859 = sst [smem:[#allocation7_spill]] %s4827_s0 }
   0x2   :  { %4860 = sst [smem:[#allocation8_spill]] %s4828_s1 }
   0x3   :  { %4861 = sst [smem:[#allocation9_spill]] %s4829_s2 }
   0x4   :  { %4862 = sst [smem:[#allocation10_spill]] %s4830_s3 }
   0x5   :  { %4863 = sst [smem:[#allocation11_spill]] %s4831_s4 }
   0x6   :  { %4864 = sst [smem:[#allocation12_spill]] %s4832_s5 }
   0x7   :  { %4865 = sst [smem:[#allocation13_spill]] %s4833_s6 }
   0x8   :  { %4866 = sst [smem:[#allocation14_spill]] %s4834_s7 }
   0x9   :  { %4867 = sst [smem:[#allocation15_spill]] %s4843_s16 }
   0xa   :  { %4868 = sst [smem:[#allocation16_spill]] %s4844_s17 }
   0xb   :  { %4869 = sst [smem:[#allocation17_spill]] %s4845_s18 }
   0xc   :  { %4870 = sst [smem:[#allocation18_spill]] %s4846_s19 }
   0xd   :  { %4871 = sst [smem:[#allocation19_spill]] %s4847_s20 }
   0xe   :  { %4872 = sst [smem:[#allocation20_spill]] %s4848_s21 }
   0xf   :  { %4873 = sst [smem:[#allocation21_spill]] %s4849_s22 }
  0x10   :  { %4874 = sst [smem:[#allocation22_spill]] %s4850_s23 }
  0x11   :  { %s4875_s24 = sld [smem:[#allocation7_spill]] }
  0x17   :  { %s28_s17 = sshll.u32 %s4875_s24, 4  ;;  %s29_s17 = int_to_ptr.vmem [resolvable:$true] %s28_s17 }
  0x18   :  { %s4025_s25 = scalar_lea.vmem %s29_s17, 32  ;;  %p4030_p1 = scmp.lt.s32.totalorder %s29_s17, %s29_s17 }
  0x19   :  { %p4026_p0 = scmp.ne.s32.totalorder %s29_s17, %s4025_s25  ;;  %p4031_p2 = scmp.lt.s32.totalorder %s4025_s25, %s4025_s25 }
  0x1b   :  { %p4032_p3 = por %p4031_p2, %p4030_p1 }
  0x1d   :  { %p4033_p4 = pnand %p4032_p3, %p4026_p0 }
  0x1f   :  { %4036 = shalt.err (!%p4033_p4)  }
  0x20   :  { %s4047_s5 = smov [#allocation4]  }
  0x21   :  { %31 = dma.vmem_to_smem %s29_s17, 32, %s4047_s5, [#allocation3] }
  0x22   :  { %4041 = dma.done.wait [#allocation3], 32 }
  0x23   :  { %4042 = vsyncadd [#allocation3], 4294967264 }
  0x24   :  { %33 = sfence }
  0x25   :  { %s4173_s1 = smov 0  }
  0x26 LB: > { %4876 = sst [smem:[#allocation6_spill]] %s4045_s1  ;;  %s4179_s26 = sadd.s32 4294967295, %s4045_s1   ;;  %s4045_s1 = sphi %s4173_s1, %s39_s1  }
  0x27   : > { %p3450_p5 = scmp.ge.s32.totalorder %s4045_s1, 1  ;;  %p617_p6 = scmp.lt.s32.totalorder %s4045_s1, 3 }
  0x29   : > { %p618_p7 = pnand %p3450_p5, %p617_p6 }
  0x2a   : > { %s3452_s17 = sshll.u32 (!%p618_p7), %s4179_s26, 7  ;;  %s4877_s1 = sld [smem:[#allocation9_spill]] (!%p618_p7) }
  0x2b   : > { %621 = sbr.rel (%p618_p7) target bundleno = 5087 (0x13df), region = 108  ;;  %s684_s2 = sld [smem:[#allocation4 + %s3452_s17]] (!%p618_p7) }
  0x2c   : > { %s689_s6 = sadd.s32 (!%p618_p7), 1, %s3452_s17  ;;  %s694_s7 = sadd.s32 (!%p618_p7), 2, %s3452_s17 }
  0x2d   : > { %s690_s27 = sld [smem:[#allocation4 + %s689_s6]] (!%p618_p7)  ;;  %s699_s29 = sadd.s32 (!%p618_p7), 3, %s3452_s17 }
  0x2e   : > { %s695_s28 = sld [smem:[#allocation4 + %s694_s7]] (!%p618_p7)  ;;  %s704_s0 = sadd.s32 (!%p618_p7), 4, %s3452_s17 }
  0x2f   : > { %s700_s3 = sld [smem:[#allocation4 + %s699_s29]] (!%p618_p7)  ;;  %s709_s30 = sadd.s32 (!%p618_p7), 5, %s3452_s17 }
  0x30   : > { %s705_s4 = sld [smem:[#allocation4 + %s704_s0]]  ;;  %vm687_vm0 = vcmask 253952   ;;  %s714_s25 = sadd.s32 6, %s3452_s17  ;;  %vm737_vm1 = vcmask 261120   ;;  %v4048_v19 = vmov 0.0   ;;  %vm4049_vm2 = vmmov 0  }
  0x31   : > { %s710_s24 = sld [smem:[#allocation4 + %s709_s30]]  ;;  %s4878_s22 = smov %s4877_s1  ;;  %3700 = vmatprep.subr.mxu0 %v4048_v19  ;;  %3711 = vmatprep.subr.mxu1 %v4048_v19  ;;  %v3459_v57 = vld [vmem:[%s4835_s8 + $0x2] ss:$0 sm:$0xff]  ;;  %vm1262_vm3 = vcmask 130048   ;;  %v3457_v60 = vld [vmem:[%s4835_s8] ss:$0 sm:$0xff] }
  0x32   : > { %s685_s20 = scalar_lea.vmem %s4877_s1, %s684_s2  ;;  %s715_s21 = sld [smem:[#allocation4 + %s714_s25]]  ;;  %3708 = vmatprep.mubr.msk.f32.mxu0 %vm4049_vm2, %v4048_v19  ;;  %3719 = vmatprep.mubr.msk.f32.mxu1 %vm4049_vm2, %v4048_v19  ;;  %v3460_v62 = vld [vmem:[%s4835_s8 + $0x3] ss:$0 sm:$0xff]  ;;  %vm1419_vm4 = vcmask 64512   ;;  %vm1887_vm5 = vcmask 523264  }
  0x33   : > { %v686_v0 = vld [vmem:[%s685_s20] sm:$0x1]  ;;  %s691_s6 = scalar_lea.vmem %s4878_s22, %s690_s27  ;;  %s719_s16 = sadd.s32 7, %s3452_s17 }
  0x34   : > { %688 = vst.msk [vmem:[#allocation2] sm:$0x1] %vm687_vm0, %v686_v0  ;;  %v692_v1 = vld [vmem:[%s691_s6] sm:$0x1]  ;;  %s696_s0 = scalar_lea.vmem %s4878_s22, %s695_s28  ;;  %s720_s30 = sld [smem:[#allocation4 + %s719_s16]] }
  0x35   : > { %693 = vst.msk [vmem:[#allocation2 + $0x1] sm:$0x1] %vm687_vm0, %v692_v1  ;;  %v697_v2 = vld [vmem:[%s696_s0] sm:$0x1]  ;;  %s701_s20 = scalar_lea.vmem %s4878_s22, %s700_s3  ;;  %s4879_s29 = sld [smem:[#allocation10_spill]] }
  0x36   : > { %698 = vst.msk [vmem:[#allocation2 + $0x2] sm:$0x1] %vm687_vm0, %v697_v2  ;;  %v702_v3 = vld [vmem:[%s701_s20] sm:$0x1]  ;;  %s706_s17 = scalar_lea.vmem %s4878_s22, %s705_s4  ;;  %s4881_s20 = sld [smem:[#allocation14_spill]] }
  0x37   : > { %703 = vst.msk [vmem:[#allocation2 + $0x3] sm:$0x1] %vm687_vm0, %v702_v3  ;;  %v707_v4 = vld [vmem:[%s706_s17] sm:$0x1]  ;;  %s711_s16 = scalar_lea.vmem %s4878_s22, %s710_s24  ;;  %s4882_s23 = sld [smem:[#allocation12_spill]] }
  0x38   : > { %708 = vst.msk [vmem:[#allocation2 + $0x4] sm:$0x1] %vm687_vm0, %v707_v4  ;;  %v712_v5 = vld [vmem:[%s711_s16] sm:$0x1]  ;;  %s716_s3 = scalar_lea.vmem %s4878_s22, %s715_s21  ;;  %s4880_s21 = sld [smem:[#allocation11_spill]] }
  0x39   : > { %713 = vst.msk [vmem:[#allocation2 + $0x5] sm:$0x1] %vm687_vm0, %v712_v5  ;;  %v717_v6 = vld [vmem:[%s716_s3] sm:$0x1]  ;;  %s4883_s1 = sld [smem:[#allocation13_spill]]  ;;  %p676_p8 = scmp.lt.s32.totalorder %s4179_s26, 1 }
  0x3a   : > { %718 = vst.msk [vmem:[#allocation2 + $0x6] sm:$0x1] %vm687_vm0, %v717_v6  ;;  %s721_s6 = scalar_lea.vmem %s4878_s22, %s720_s30  ;;  %v3458_v2 = vld [vmem:[%s4835_s8 + $0x1] ss:$0 sm:$0xff]  ;;  %v3461_v5 = vld [vmem:[%s4835_s8 + $0x4] ss:$0 sm:$0xff] }
  0x3b   : > { %v722_v7 = vld [vmem:[%s721_s6] sm:$0x1]  ;;  %v3462_v6 = vld [vmem:[%s4835_s8 + $0x5] ss:$0 sm:$0xff]  ;;  %s4895_s26 = smov (!%p676_p8, %s4179_s26), 1  ;;  %s4884_s28 = sld [smem:[#allocation8_spill]] }
  0x3c   : > { %723 = vst.msk [vmem:[#allocation2 + $0x7] sm:$0x1] %vm687_vm0, %v722_v7  ;;  %v725_v8 = vld [vmem:[%s4879_s29] sm:$0xff]  ;;  %v776_v20 = vld [vmem:[%s4881_s20 + $0x18] sm:$0xff]  ;;  %v775_v22 = vld [vmem:[%s4881_s20 + $0x10] sm:$0xff]  ;;  %s4885_s5 = sld [smem:[#allocation15_spill]] }
  0x3d   : > { %v780_v21 = vld [vmem:[%s4881_s20 + $0x38] sm:$0xff]  ;;  %3701 = vmatpush3.msra.mxu0 %v776_v20  ;;  %v779_v23 = vld [vmem:[%s4881_s20 + $0x30] sm:$0xff]  ;;  %v774_v24 = vld [vmem:[%s4881_s20 + $0x8] sm:$0xff]  ;;  %s4886_s4 = sld [smem:[#allocation16_spill]]  ;;  %s3451_s27 = sshll.u32 %s4895_s26, 3 }
  0x3e   : > { %v3453_v10 = vld [vmem:[%s4880_s21] ss:$0 sm:$0xff]  ;;  %3712 = vmatpush3.msra.mxu1 %v780_v21  ;;  %3702 = vmatprep.subr.mxu0 %v4048_v19  ;;  %v778_v25 = vld [vmem:[%s4881_s20 + $0x28] sm:$0xff]  ;;  %v784_v37 = vld [vmem:[%s4881_s20 + $0x58] sm:$0xff]  ;;  %s4887_s7 = sld [smem:[#allocation17_spill]] }
  0x3f   : > { %3713 = vmatprep.subr.mxu1 %v4048_v19  ;;  %3703 = vmatpush3.msra.mxu0 %v775_v22  ;;  %v773_v26 = vld [vmem:[%s4881_s20] sm:$0xff]  ;;  %v788_v38 = vld [vmem:[%s4881_s20 + $0x78] sm:$0xff]  ;;  %v783_v39 = vld [vmem:[%s4881_s20 + $0x50] sm:$0xff]  ;;  %s4888_s21 = sld [smem:[#allocation18_spill]] }
  0x40   : > { %3714 = vmatpush3.msra.mxu1 %v779_v23  ;;  %3704 = vmatprep.subr.mxu0 %v4048_v19  ;;  %v777_v27 = vld [vmem:[%s4881_s20 + $0x20] sm:$0xff]  ;;  %v787_v40 = vld [vmem:[%s4881_s20 + $0x70] sm:$0xff]  ;;  %v782_v41 = vld [vmem:[%s4881_s20 + $0x48] sm:$0xff]  ;;  %s4889_s24 = sld [smem:[#allocation20_spill]] }
  0x41   : > { %3715 = vmatprep.subr.mxu1 %v4048_v19  ;;  %3705 = vmatpush3.msra.mxu0 %v774_v24  ;;  %v3454_v32 = vld [vmem:[%s4882_s23] ss:$0 sm:$0xff]  ;;  %v786_v42 = vld [vmem:[%s4881_s20 + $0x68] sm:$0xff]  ;;  %v792_v45 = vld [vmem:[%s4881_s20 + $0x98] sm:$0xff]  ;;  %s678_s25 = scalar_lea.vmem %s4884_s28, %s4895_s26  ;;  %s4890_s2 = sld [smem:[#allocation19_spill]] }
  0x42   : > { %3716 = vmatpush3.msra.mxu1 %v778_v25  ;;  %3706 = vmatprep.subr.mxu0 %v4048_v19  ;;  %v3455_v34 = vld [vmem:[%s4883_s1] ss:$0 sm:$0xff]  ;;  %v796_v46 = vld [vmem:[%s4881_s20 + $0xb8] sm:$0xff]  ;;  %v791_v47 = vld [vmem:[%s4881_s20 + $0x90] sm:$0xff]  ;;  %s4892_s29 = sld [smem:[#allocation22_spill]] }
  0x43   : > { %v724_v9 = vld [vmem:[#allocation2] sm:$0xff]  ;;  %3717 = vmatprep.subr.mxu1 %v4048_v19  ;;  %3707 = vmatpush3.msra.mxu0 %v773_v26  ;;  %v795_v48 = vld [vmem:[%s4881_s20 + $0xb0] sm:$0xff]  ;;  %v790_v49 = vld [vmem:[%s4881_s20 + $0x88] sm:$0xff] }
  0x44   : > { %v726_v11 = vadd.f32 %v725_v8, %v724_v9  ;;  %3718 = vmatpush3.msra.mxu1 %v777_v27  ;;  %3722 = vmatprep.subr.mxu0 %v4048_v19  ;;  %v781_v43 = vld [vmem:[%s4881_s20 + $0x40] sm:$0xff]  ;;  %v794_v50 = vld [vmem:[%s4881_s20 + $0xa8] sm:$0xff] }
  0x45   : > { %3733 = vmatprep.subr.mxu1 %v4048_v19  ;;  %v785_v44 = vld [vmem:[%s4881_s20 + $0x60] sm:$0xff] }
  0x46   : > { %v734_v12 = vadd.f32 %v3453_v10, %v726_v11  ;;  %v789_v51 = vld [vmem:[%s4881_s20 + $0x80] sm:$0xff] }
  0x47   : > { %v793_v52 = vld [vmem:[%s4881_s20 + $0xa0] sm:$0xff] }
  0x48   : > { %v738_v13 = vsel %vm737_vm1, %v734_v12, 0.0  ;;  %s682_s0 = scalar_lea.vmem %s4892_s29, %s3451_s27 }
  0x49   : > { %739 = vadd.xlane.f32.xlu0 %v738_v13 }
  0xd2   : > { %v740_v14 = vpop.xlane.xlu0 %739 }
  0xd3   : > { %v742_v15 = vmul.f32 0.03125, %v740_v14  ;;  %v4396_v14 = vld [vmem:[%s678_s25] ss:$0 sm:$0xff]  ;;  %s4891_s25 = sld [smem:[#allocation21_spill]] }
  0xd5   : > { %v743_v16 = vsub.f32 %v734_v12, %v742_v15 }
  0xd7   : > { %v744_v17 = vmul.f32 %v743_v16, %v743_v16 }
  0xd9   : > { %v745_v18 = vsel %vm737_vm1, %v744_v17, 0.0 }
  0xda   : > { %746 = vadd.xlane.f32.xlu0 %v745_v18 }
 0x163   : > { %v747_v28 = vpop.xlane.xlu0 %746 }
 0x164   : > { %v748_v29 = vmul.f32 0.03125, %v747_v28 }
 0x166   : > { %v749_v30 = vadd.f32 1e-12, %v748_v29 }
 0x168   : > { %3993 = vrsqrt.f32 %v749_v30 }
 0x175   : > { %v3994_v31 = vpop.eup %3993 }
 0x176   : > { %v751_v33 = vmul.f32 %v3994_v31, %v743_v16 }
 0x178   : > { %v758_v35 = vmul.f32 %v3454_v32, %v751_v33 }
 0x17a   : > { %v4268_v36 = vadd.f32 %v3455_v34, %v758_v35 }
 0x17c   : > { %3709 = vmatmul.mubr.msk.f32.vlgmr.msra.gmra.mxu0 %vm737_vm1, %v4268_v36  ;;  %3720 = vmatmul.mubr.msk.f32.vlgmr.msra.gmra.mxu1 %vm737_vm1, %v4268_v36 }
 0x17d   : > { %3723 = vmatpush3.msra.mxu0 %v784_v37  ;;  %3734 = vmatpush3.msra.mxu1 %v788_v38 }
 0x17e   : > { %3724 = vmatprep.subr.mxu0 %v4048_v19  ;;  %3735 = vmatprep.subr.mxu1 %v4048_v19 }
 0x17f   : > { %3725 = vmatpush3.msra.mxu0 %v783_v39  ;;  %3736 = vmatpush3.msra.mxu1 %v787_v40  ;;  %v1589_v40 = vld [vmem:[%s4836_s9 + $0x8] sm:$0xff] }
 0x180   : > { %3726 = vmatprep.subr.mxu0 %v4048_v19  ;;  %3737 = vmatprep.subr.mxu1 %v4048_v19 }
 0x181   : > { %3727 = vmatpush3.msra.mxu0 %v782_v41  ;;  %3738 = vmatpush3.msra.mxu1 %v786_v42 }
 0x182   : > { %3728 = vmatprep.subr.mxu0 %v4048_v19  ;;  %3739 = vmatprep.subr.mxu1 %v4048_v19 }
 0x183   : > { %3729 = vmatpush3.msra.mxu0 %v781_v43  ;;  %3730 = vmatprep.mubr.msk.f32.mxu0 %vm4049_vm2, %v4048_v19  ;;  %v1588_v43 = vld [vmem:[%s4836_s9] sm:$0xff] }
 0x184   : > { %3740 = vmatpush3.msra.mxu1 %v785_v44  ;;  %3741 = vmatprep.mubr.msk.f32.mxu1 %vm4049_vm2, %v4048_v19  ;;  %v1591_v44 = vld [vmem:[%s4836_s9 + $0x18] sm:$0xff] }
 0x185   : > { %3731 = vmatmul.mubr.msk.f32.vlgmr.msra.gmra.mxu0 %vm737_vm1, %v4268_v36  ;;  %3742 = vmatmul.mubr.msk.f32.vlgmr.msra.gmra.mxu1 %vm737_vm1, %v4268_v36 }
 0x186   : > { %3744 = vmatprep.subr.mxu0 %v4048_v19  ;;  %3755 = vmatprep.subr.mxu1 %v4048_v19 }
 0x187   : > { %3745 = vmatpush3.msra.mxu0 %v792_v45  ;;  %3756 = vmatpush3.msra.mxu1 %v796_v46  ;;  %v1590_v45 = vld [vmem:[%s4836_s9 + $0x10] sm:$0xff] }
 0x188   : > { %3746 = vmatprep.subr.mxu0 %v4048_v19  ;;  %3757 = vmatprep.subr.mxu1 %v4048_v19 }
 0x189   : > { %3747 = vmatpush3.msra.mxu0 %v791_v47  ;;  %3758 = vmatpush3.msra.mxu1 %v795_v48 }
 0x18a   : > { %3748 = vmatprep.subr.mxu0 %v4048_v19  ;;  %3759 = vmatprep.subr.mxu1 %v4048_v19 }
 0x18b   : > { %3749 = vmatpush3.msra.mxu0 %v790_v49  ;;  %3760 = vmatpush3.msra.mxu1 %v794_v50 }
 0x18c   : > { %3750 = vmatprep.subr.mxu0 %v4048_v19  ;;  %3761 = vmatprep.subr.mxu1 %v4048_v19 }
 0x18d   : > { %3751 = vmatpush3.msra.mxu0 %v789_v51  ;;  %3752 = vmatprep.mubr.msk.f32.mxu0 %vm4049_vm2, %v4048_v19 }
 0x18e   : > { %3762 = vmatpush3.msra.mxu1 %v793_v52  ;;  %3763 = vmatprep.mubr.msk.f32.mxu1 %vm4049_vm2, %v4048_v19 }
 0x18f   : > { %3753 = vmatmul.mubr.msk.f32.vlgmr.msra.gmra.mxu0 %vm737_vm1, %v4268_v36  ;;  %3764 = vmatmul.mubr.msk.f32.vlgmr.msra.gmra.mxu1 %vm737_vm1, %v4268_v36 }
 0x190   : > { %3766 = vmatprep.subr.mxu1 %v4048_v19  ;;  %3768 = vmatprep.mubr.msk.f32.mxu1 %vm4049_vm2, %v4048_v19 }
 0x191   : > { %3776 = vmatprep.subr.mxu0 %v4048_v19  ;;  %3778 = vmatprep.mubr.msk.f32.mxu0 %vm4049_vm2, %v4048_v19 }
 0x23c   : > { %v908_v53 = vpop.f32.mrf.mxu0  ;;  %v978_v54 = vpop.f32.mrf.mxu1 }
 0x23d   : > { %v909_v1 = vadd.f32 %v3457_v60, %v908_v53  ;;  %v979_v4 = vadd.f32 %v3458_v2, %v978_v54  ;;  %v1782_v2 = vld [vmem:[%s4840_s13 + $0x18] sm:$0xff] }
 0x23e   : > { %v3710_v55 = vpop.f32.mrf.mxu0  ;;  %v3721_v56 = vpop.f32.mrf.mxu1 }
 0x23f   : > { %v3477_v55 = vld [vmem:[%s4837_s10] ss:$0 sm:$0xff] }
 0x245   : > { %v1048_v58 = vpop.f32.mrf.mxu0  ;;  %v1118_v59 = vpop.f32.mrf.mxu1 }
 0x246   : > { %v1049_v61 = vadd.f32 %v3459_v57, %v1048_v58  ;;  %v1119_v3 = vadd.f32 %v3460_v62, %v1118_v59 }
 0x247   : > { %v3732_v63 = vpop.f32.mrf.mxu0  ;;  %v3743_v0 = vpop.f32.mrf.mxu1 }
 0x248   : > { %3767 = vmatpush3.xpose.msk.msra.mxu1 %vm1262_vm3, %v1049_v61 }
 0x249   : > { %3771 = vmatprep.subr.mxu1 %v4048_v19 }
 0x24b   : > { %3769 = vmatmul.mubr.msk.f32.vlgmr.msra.gmra.mxu1 %vm1262_vm3, %v909_v1 }
 0x24c   : > { %3772 = vmatpush3.xpose.msk.msra.mxu1 %vm1262_vm3, %v1119_v3  ;;  %3773 = vmatprep.mubr.msk.f32.mxu1 %vm4049_vm2, %v4048_v19  ;;  %v1781_v3 = vld [vmem:[%s4840_s13 + $0x10] sm:$0xff] }
 0x24d   : > { %3781 = vmatprep.subr.mxu1 %v4048_v19 }
 0x24f   : > { %v1188_v7 = vpop.f32.mrf.mxu0  ;;  %v1258_v8 = vpop.f32.mrf.mxu1  ;;  %3774 = vmatmul.mubr.msk.f32.vlgmr.msra.gmra.mxu1 %vm1262_vm3, %v979_v4  ;;  %v1779_v4 = vld [vmem:[%s4840_s13] sm:$0xff] }
 0x250   : > { %v1189_v9 = vadd.f32 %v3461_v5, %v1188_v7  ;;  %v1259_v10 = vadd.f32 %v3462_v6, %v1258_v8  ;;  %3783 = vmatprep.mubr.msk.f32.mxu1 %vm4049_vm2, %v4048_v19 }
 0x251   : > { %v3754_v11 = vpop.f32.mrf.mxu0  ;;  %v3765_v12 = vpop.f32.mrf.mxu1 }
 0x252   : > { %3777 = vmatpush3.msra.mxu0 %v1189_v9  ;;  %3782 = vmatpush3.msra.mxu1 %v1259_v10  ;;  %v3478_v9 = vld [vmem:[%s4838_s11] ss:$0 sm:$0xff] }
 0x253   : > { %3786 = vmatprep.subr.mxu0 %v4048_v19  ;;  %3793 = vmatprep.subr.mxu1 %v4048_v19  ;;  %v3479_v11 = vld [vmem:[%s4839_s12] ss:$0 sm:$0xff] }
 0x30b   : > { %v1335_v13 = vpop.f32.mrf.mxu1 }
 0x30c   : > { %v1415_v15 = vmul.f32 0.25, %v1335_v13 }
 0x30d   : > { %v3770_v16 = vpop.f32.mrf.mxu1 }
 0x30e   : > { %v1417_v17 = vadd.f32 %v4396_v14, %v1415_v15  ;;  %v1879_v15 = vld [vmem:[%s4842_s15 + $0x38] sm:$0xff]  ;;  %v1878_v16 = vld [vmem:[%s4842_s15 + $0x30] sm:$0xff] }
 0x30f   : > { %v1411_v18 = vpop.f32.mrf.mxu1 }
 0x310   : > { %v1416_v20 = vmul.f32 0.25, %v1411_v18  ;;  %v1420_v21 = vsel %vm1419_vm4, %v1417_v17, -inf  ;;  %v1876_v18 = vld [vmem:[%s4842_s15 + $0x20] sm:$0xff] }
 0x311   : > { %v3775_v22 = vpop.f32.mrf.mxu1  ;;  %1421 = vmax.xlane.f32.xlu1 %v1420_v21  ;;  %v1874_v21 = vld [vmem:[%s4842_s15 + $0x10] sm:$0xff] }
 0x312   : > { %v1418_v23 = vadd.f32 %v4396_v14, %v1416_v20  ;;  %v1875_v20 = vld [vmem:[%s4842_s15 + $0x18] sm:$0xff]  ;;  %v1873_v22 = vld [vmem:[%s4842_s15 + $0x8] sm:$0xff] }
 0x314   : > { %v1423_v24 = vsel %vm1419_vm4, %v1418_v23, -inf }
 0x315   : > { %1424 = vmax.xlane.f32.xlu1 %v1423_v24  ;;  %v3480_v24 = vld [vmem:[%s4841_s14] ss:$0 sm:$0xff] }
 0x39a   : > { %v1422_v25 = vpop.xlane.xlu1 %1421 }
 0x39b   : > { %v1426_v26 = vsub.f32 %v1417_v17, %v1422_v25  ;;  %v1877_v17 = vld [vmem:[%s4842_s15 + $0x28] sm:$0xff] }
 0x39d   : > { %v1428_v27 = vmul.f32 1.442695, %v1426_v26 }
 0x39e   : > { %v1425_v28 = vpop.xlane.xlu1 %1424 }
 0x39f   : > { %3995 = vpow2.f32 %v1428_v27  ;;  %v1427_v29 = vsub.f32 %v1418_v23, %v1425_v28  ;;  %v1872_v23 = vld [vmem:[%s4842_s15] sm:$0xff] }
 0x3a1   : > { %v1430_v30 = vmul.f32 1.442695, %v1427_v29 }
 0x3a3   : > { %3997 = vpow2.f32 %v1430_v30 }
 0x3ac   : > { %v3996_v31 = vpop.eup %3995 }
 0x3ad   : > { %v1432_v32 = vsel %vm1419_vm4, %v3996_v31, 0.0 }
 0x3ae   : > { %1433 = vadd.xlane.f32.xlu0 %v1432_v32 }
 0x3b0   : > { %v3998_v33 = vpop.eup %3997 }
 0x3b1   : > { %v1435_v34 = vsel %vm1419_vm4, %v3998_v33, 0.0 }
 0x3b2   : > { %1436 = vadd.xlane.f32.xlu1 %v1435_v34 }
 0x437   : > { %v1434_v35 = vpop.xlane.xlu0 %1433 }
 0x438   : > { %3999 = vrcp.f32 %v1434_v35 }
 0x43b   : > { %v1437_v37 = vpop.xlane.xlu1 %1436 }
 0x43c   : > { %4001 = vrcp.f32 %v1437_v37 }
 0x445   : > { %v4000_v38 = vpop.eup %3999 }
 0x446   : > { %v1439_v39 = vmul.f32 %v4000_v38, %v3996_v31  ;;  %v3482_v38 = vld [vmem:[%s4885_s5] ss:$0 sm:$0xff] }
 0x448   : > { %3779 = vmatmul.mubr.msk.f32.vlgmr.msra.gmra.mxu0 %vm1419_vm4, %v1439_v39 }
 0x449   : > { %v4002_v41 = vpop.eup %4001  ;;  %3787 = vmatpush3.msra.mxu0 %v1589_v40  ;;  %3790 = vmatprep.mubr.msk.f32.mxu0 %vm4049_vm2, %v4048_v19 }
 0x44a   : > { %v1441_v42 = vmul.f32 %v4002_v41, %v3998_v33  ;;  %3788 = vmatprep.subr.mxu0 %v4048_v19 }
 0x44b   : > { %3789 = vmatpush3.msra.mxu0 %v1588_v43 }
 0x44c   : > { %3784 = vmatmul.mubr.msk.f32.vlgmr.msra.gmra.mxu1 %vm1419_vm4, %v1441_v42  ;;  %3800 = vmatprep.subr.mxu0 %v4048_v19 }
 0x44d   : > { %3797 = vmatprep.mubr.msk.f32.mxu1 %vm4049_vm2, %v4048_v19  ;;  %3794 = vmatpush3.msra.mxu1 %v1591_v44 }
 0x44e   : > { %3795 = vmatprep.subr.mxu1 %v4048_v19 }
 0x44f   : > { %3796 = vmatpush3.msra.mxu1 %v1590_v45 }
 0x450   : > { %3811 = vmatprep.subr.mxu1 %v4048_v19 }
 0x508   : > { %v1511_v46 = vpop.f32.mrf.mxu0 }
 0x509   : > { %3791 = vmatmul.mubr.msk.f32.vlgmr.msra.gmra.mxu0 %vm1262_vm3, %v1511_v46 }
 0x50a   : > { %v3780_v47 = vpop.f32.mrf.mxu0  ;;  %3808 = vmatprep.mubr.msk.f32.mxu0 %vm4049_vm2, %v4048_v19  ;;  %3801 = vmatpush3.msra.mxu0 %v1782_v2  ;;  %v3493_v2 = vld [vmem:[%s4881_s20 + $0xf8] sm:$0xff] }
 0x50b   : > { %3802 = vmatprep.subr.mxu0 %v4048_v19 }
 0x50c   : > { %v1584_v48 = vpop.f32.mrf.mxu1  ;;  %3803 = vmatpush3.msra.mxu0 %v1781_v3  ;;  %v3505_v3 = vld [vmem:[%s4881_s20 + $0x158] sm:$0xff] }
 0x50d   : > { %3798 = vmatmul.mubr.msk.f32.vlgmr.msra.gmra.mxu1 %vm1262_vm3, %v1584_v48  ;;  %3804 = vmatprep.subr.mxu0 %v4048_v19 }
 0x50e   : > { %v3785_v49 = vpop.f32.mrf.mxu1  ;;  %3827 = vmatprep.mubr.msk.f32.mxu1 %vm4049_vm2, %v4048_v19  ;;  %3812 = vmatpush3.msra.mxu1 %v1879_v15  ;;  %v3508_v15 = vld [vmem:[%s4881_s20 + $0x170] sm:$0xff] }
 0x50f   : > { %3813 = vmatprep.subr.mxu1 %v4048_v19  ;;  %v3489_v49 = vld [vmem:[%s4881_s20 + $0xd8] sm:$0xff] }
 0x510   : > { %3814 = vmatpush3.msra.mxu1 %v1878_v16  ;;  %v3507_v16 = vld [vmem:[%s4881_s20 + $0x168] sm:$0xff] }
 0x511   : > { %3815 = vmatprep.subr.mxu1 %v4048_v19 }
 0x512   : > { %3816 = vmatpush3.msra.mxu1 %v1877_v17  ;;  %v3506_v17 = vld [vmem:[%s4881_s20 + $0x160] sm:$0xff] }
 0x513   : > { %3817 = vmatprep.subr.mxu1 %v4048_v19 }
 0x514   : > { %3818 = vmatpush3.msra.mxu1 %v1876_v18  ;;  %v3518_v18 = vld [vmem:[%s4835_s8 + $0x8] ss:$0 sm:$0xff] }
 0x515   : > { %3819 = vmatprep.subr.mxu1 %v4048_v19 }
 0x516   : > { %3820 = vmatpush3.msra.mxu1 %v1875_v20 }
 0x517   : > { %3821 = vmatprep.subr.mxu1 %v4048_v19 }
 0x518   : > { %3822 = vmatpush3.msra.mxu1 %v1874_v21 }
 0x519   : > { %3823 = vmatprep.subr.mxu1 %v4048_v19 }
 0x51a   : > { %3824 = vmatpush3.msra.mxu1 %v1873_v22  ;;  %v3516_v22 = vld [vmem:[%s4835_s8 + $0x6] ss:$0 sm:$0xff] }
 0x51b   : > { %3825 = vmatprep.subr.mxu1 %v4048_v19 }
 0x51c   : > { %3826 = vmatpush3.msra.mxu1 %v1872_v23 }
 0x51d   : > { %3852 = vmatprep.subr.mxu1 %v4048_v19 }
 0x5c9   : > { %v1661_v50 = vpop.f32.mrf.mxu0 }
 0x5ca   : > { %v1738_v53 = vsel %vm737_vm1, %v1661_v50, 0.0  ;;  %v3497_v50 = vld [vmem:[%s4881_s20 + $0x118] sm:$0xff] }
 0x5cb   : > { %v3792_v51 = vpop.f32.mrf.mxu0 }
 0x5cc   : > { %v3488_v51 = vld [vmem:[%s4881_s20 + $0xd0] sm:$0xff] }
 0x5cd   : > { %v1734_v52 = vpop.f32.mrf.mxu1 }
 0x5ce   : > { %v1739_v54 = vsel %vm737_vm1, %v1734_v52, 0.0  ;;  %v3496_v52 = vld [vmem:[%s4881_s20 + $0x110] sm:$0xff] }
 0x5cf   : > { %v1740_v56 = vadd.f32 %v1739_v54, %v1738_v53  ;;  %v3799_v57 = vpop.f32.mrf.mxu1  ;;  %v3487_v53 = vld [vmem:[%s4881_s20 + $0xc8] sm:$0xff] }
 0x5d0   : > { %v3495_v54 = vld [vmem:[%s4881_s20 + $0x108] sm:$0xff] }
 0x5d1   : > { %v1748_v58 = vadd.f32 %v3477_v55, %v1740_v56  ;;  %v3486_v55 = vld [vmem:[%s4881_s20 + $0xc0] sm:$0xff] }
 0x5d2   : > { %v3494_v56 = vld [vmem:[%s4881_s20 + $0x100] sm:$0xff] }
 0x5d3   : > { %v1749_v59 = vadd.f32 %v1748_v58, %v4268_v36  ;;  %v1780_v36 = vld [vmem:[%s4840_s13 + $0x8] sm:$0xff] }
 0x5d4   : > { %3805 = vmatpush3.msra.mxu0 %v1780_v36  ;;  %v3492_v36 = vld [vmem:[%s4881_s20 + $0xf0] sm:$0xff] }
 0x5d5   : > { %v1752_v60 = vsel %vm737_vm1, %v1749_v59, 0.0  ;;  %3806 = vmatprep.subr.mxu0 %v4048_v19 }
 0x5d6   : > { %1753 = vadd.xlane.f32.xlu0 %v1752_v60  ;;  %3807 = vmatpush3.msra.mxu0 %v1779_v4  ;;  %v3504_v4 = vld [vmem:[%s4881_s20 + $0x150] sm:$0xff] }
 0x5d7   : > { %3830 = vmatprep.subr.mxu0 %v4048_v19 }
 0x65f   : > { %v1754_v61 = vpop.xlane.xlu0 %1753 }
 0x660   : > { %v1755_v62 = vmul.f32 0.03125, %v1754_v61  ;;  %v3484_v61 = vld [vmem:[%s4886_s4] ss:$0 sm:$0xff] }
 0x662   : > { %v1756_v63 = vsub.f32 %v1749_v59, %v1755_v62 }
 0x664   : > { %v1757_v0 = vmul.f32 %v1756_v63, %v1756_v63 }
 0x666   : > { %v1758_v1 = vsel %vm737_vm1, %v1757_v0, 0.0 }
 0x667   : > { %1759 = vadd.xlane.f32.xlu1 %v1758_v1 }
 0x6f0   : > { %v1760_v5 = vpop.xlane.xlu1 %1759 }
 0x6f1   : > { %v1761_v6 = vmul.f32 0.03125, %v1760_v5  ;;  %v3491_v5 = vld [vmem:[%s4881_s20 + $0xe8] sm:$0xff] }
 0x6f3   : > { %v1762_v7 = vadd.f32 1e-12, %v1761_v6  ;;  %v3503_v6 = vld [vmem:[%s4881_s20 + $0x148] sm:$0xff] }
 0x6f5   : > { %4003 = vrsqrt.f32 %v1762_v7  ;;  %v3490_v7 = vld [vmem:[%s4881_s20 + $0xe0] sm:$0xff] }
 0x702   : > { %v4004_v8 = vpop.eup %4003 }
 0x703   : > { %v1764_v10 = vmul.f32 %v4004_v8, %v1756_v63  ;;  %v3485_v63 = vld [vmem:[%s4887_s7] ss:$0 sm:$0xff] }
 0x704   : > { %v3502_v8 = vld [vmem:[%s4881_s20 + $0x140] sm:$0xff] }
 0x705   : > { %v1771_v12 = vmul.f32 %v3478_v9, %v1764_v10  ;;  %v3501_v9 = vld [vmem:[%s4881_s20 + $0x138] sm:$0xff]  ;;  %v3500_v10 = vld [vmem:[%s4881_s20 + $0x130] sm:$0xff] }
 0x707   : > { %v1778_v13 = vadd.f32 %v3479_v11, %v1771_v12  ;;  %v3499_v11 = vld [vmem:[%s4881_s20 + $0x128] sm:$0xff]  ;;  %v3498_v12 = vld [vmem:[%s4881_s20 + $0x120] sm:$0xff] }
 0x709   : > { %3809 = vmatmul.mubr.msk.f32.vlgmr.msra.gmra.mxu0 %vm737_vm1, %v1778_v13 }
 0x70a   : > { %3838 = vmatprep.mubr.msk.f32.mxu0 %vm4049_vm2, %v4048_v19  ;;  %3831 = vmatpush3.msra.mxu0 %v3489_v49 }
 0x70b   : > { %3832 = vmatprep.subr.mxu0 %v4048_v19 }
 0x70c   : > { %3833 = vmatpush3.msra.mxu0 %v3488_v51 }
 0x70d   : > { %3834 = vmatprep.subr.mxu0 %v4048_v19 }
 0x70e   : > { %3835 = vmatpush3.msra.mxu0 %v3487_v53 }
 0x70f   : > { %3836 = vmatprep.subr.mxu0 %v4048_v19 }
 0x710   : > { %3837 = vmatpush3.msra.mxu0 %v3486_v55 }
 0x711   : > { %3841 = vmatprep.subr.mxu0 %v4048_v19 }
 0x7c9   : > { %v1859_v25 = vpop.f32.mrf.mxu0 }
 0x7ca   : > { %v1860_v26 = vadd.f32 %v3480_v24, %v1859_v25 }
 0x7cb   : > { %v3810_v27 = vpop.f32.mrf.mxu0 }
 0x7cc   : > { %v1864_v28 = vmul.f32 0.044715, %v1860_v26  ;;  %v1863_v34 = vmul.f32 0.5, %v1860_v26  ;;  %v3520_v27 = vld [vmem:[%s4835_s8 + $0xa] ss:$0 sm:$0xff] }
 0x7ce   : > { %v1865_v29 = vmul.f32 %v1864_v28, %v1860_v26 }
 0x7d0   : > { %v1866_v30 = vmul.f32 %v1865_v29, %v1860_v26 }
 0x7d2   : > { %v1867_v31 = vadd.f32 %v1866_v30, %v1860_v26 }
 0x7d4   : > { %v1868_v32 = vmul.f32 0.7978846, %v1867_v31 }
 0x7d6   : > { %4005 = vtanh.f32 %v1868_v32 }
 0x7e3   : > { %v4006_v33 = vpop.eup %4005 }
 0x7e4   : > { %v1870_v35 = vadd.f32 1.0, %v4006_v33  ;;  %v3519_v33 = vld [vmem:[%s4835_s8 + $0x9] ss:$0 sm:$0xff] }
 0x7e6   : > { %v1871_v37 = vmul.f32 %v1870_v35, %v1863_v34  ;;  %v3517_v35 = vld [vmem:[%s4835_s8 + $0x7] ss:$0 sm:$0xff] }
 0x7e8   : > { %3828 = vmatmul.mubr.msk.f32.vlgmr.msra.gmra.mxu1 %vm1887_vm5, %v1871_v37 }
 0x7e9   : > { %3860 = vmatprep.mubr.msk.f32.mxu1 %vm4049_vm2, %v4048_v19  ;;  %3853 = vmatpush3.msra.mxu1 %v3497_v50 }
 0x7ea   : > { %3854 = vmatprep.subr.mxu1 %v4048_v19 }
 0x7eb   : > { %3855 = vmatpush3.msra.mxu1 %v3496_v52 }
 0x7ec   : > { %3856 = vmatprep.subr.mxu1 %v4048_v19 }
 0x7ed   : > { %3857 = vmatpush3.msra.mxu1 %v3495_v54 }
 0x7ee   : > { %3858 = vmatprep.subr.mxu1 %v4048_v19 }
 0x7ef   : > { %3859 = vmatpush3.msra.mxu1 %v3494_v56 }
 0x7f0   : > { %3874 = vmatprep.subr.mxu1 %v4048_v19 }
 0x8a8   : > { %v1957_v39 = vpop.f32.mrf.mxu1 }
 0x8a9   : > { %v1958_v40 = vadd.f32 %v3482_v38, %v1957_v39 }
 0x8aa   : > { %v3829_v41 = vpop.f32.mrf.mxu1 }
 0x8ab   : > { %v1961_v42 = vadd.f32 %v1958_v40, %v1778_v13  ;;  %v3509_v13 = vld [vmem:[%s4881_s20 + $0x178] sm:$0xff]  ;;  %v3521_v40 = vld [vmem:[%s4835_s8 + $0xb] ss:$0 sm:$0xff] }
 0x8ad   : > { %v1964_v43 = vsel %vm737_vm1, %v1961_v42, 0.0 }
 0x8ae   : > { %1965 = vadd.xlane.f32.xlu0 %v1964_v43 }
 0x937   : > { %v1966_v44 = vpop.xlane.xlu0 %1965 }
 0x938   : > { %v1967_v45 = vmul.f32 0.03125, %v1966_v44 }
 0x93a   : > { %v1968_v46 = vsub.f32 %v1961_v42, %v1967_v45 }
 0x93c   : > { %v1969_v47 = vmul.f32 %v1968_v46, %v1968_v46 }
 0x93e   : > { %v1970_v48 = vsel %vm737_vm1, %v1969_v47, 0.0 }
 0x93f   : > { %1971 = vadd.xlane.f32.xlu1 %v1970_v48 }
 0x9c8   : > { %v1972_v57 = vpop.xlane.xlu1 %1971 }
 0x9c9   : > { %v1973_v58 = vmul.f32 0.03125, %v1972_v57 }
 0x9cb   : > { %v1974_v59 = vadd.f32 1e-12, %v1973_v58 }
 0x9cd   : > { %4007 = vrsqrt.f32 %v1974_v59 }
 0x9da   : > { %v4008_v60 = vpop.eup %4007 }
 0x9db   : > { %v1976_v62 = vmul.f32 %v4008_v60, %v1968_v46 }
 0x9dd   : > { %v1983_v0 = vmul.f32 %v3484_v61, %v1976_v62 }
 0x9df   : > { %v4546_v1 = vadd.f32 %v3485_v63, %v1983_v0 }
 0x9e1   : > { %3839 = vmatmul.mubr.msk.f32.vlgmr.msra.gmra.mxu0 %vm737_vm1, %v4546_v1  ;;  %3861 = vmatmul.mubr.msk.f32.vlgmr.msra.gmra.mxu1 %vm737_vm1, %v4546_v1 }
 0x9e2   : > { %3842 = vmatpush3.msra.mxu0 %v3493_v2  ;;  %3875 = vmatpush3.msra.mxu1 %v3505_v3  ;;  %v3535_v3 = vld [vmem:[%s4836_s9 + $0x28] sm:$0xff] }
 0x9e3   : > { %3843 = vmatprep.subr.mxu0 %v4048_v19  ;;  %3876 = vmatprep.subr.mxu1 %v4048_v19 }
 0x9e4   : > { %3844 = vmatpush3.msra.mxu0 %v3492_v36  ;;  %3877 = vmatpush3.msra.mxu1 %v3504_v4 }
 0x9e5   : > { %3845 = vmatprep.subr.mxu0 %v4048_v19  ;;  %3878 = vmatprep.subr.mxu1 %v4048_v19 }
 0x9e6   : > { %3846 = vmatpush3.msra.mxu0 %v3491_v5  ;;  %3879 = vmatpush3.msra.mxu1 %v3503_v6  ;;  %v3534_v6 = vld [vmem:[%s4836_s9 + $0x20] sm:$0xff] }
 0x9e7   : > { %3847 = vmatprep.subr.mxu0 %v4048_v19  ;;  %3880 = vmatprep.subr.mxu1 %v4048_v19 }
 0x9e8   : > { %3848 = vmatpush3.msra.mxu0 %v3490_v7  ;;  %3849 = vmatprep.mubr.msk.f32.mxu0 %vm4049_vm2, %v4048_v19  ;;  %v3537_v7 = vld [vmem:[%s4836_s9 + $0x38] sm:$0xff] }
 0x9e9   : > { %3881 = vmatpush3.msra.mxu1 %v3502_v8  ;;  %3882 = vmatprep.mubr.msk.f32.mxu1 %vm4049_vm2, %v4048_v19  ;;  %v3536_v8 = vld [vmem:[%s4836_s9 + $0x30] sm:$0xff] }
 0x9ea   : > { %3850 = vmatmul.mubr.msk.f32.vlgmr.msra.gmra.mxu0 %vm737_vm1, %v4546_v1  ;;  %3863 = vmatprep.subr.mxu0 %v4048_v19 }
 0x9eb   : > { %3883 = vmatmul.mubr.msk.f32.vlgmr.msra.gmra.mxu1 %vm737_vm1, %v4546_v1  ;;  %3864 = vmatpush3.msra.mxu0 %v3501_v9 }
 0x9ec   : > { %3865 = vmatprep.subr.mxu0 %v4048_v19  ;;  %3871 = vmatprep.mubr.msk.f32.mxu0 %vm4049_vm2, %v4048_v19 }
 0x9ed   : > { %3866 = vmatpush3.msra.mxu0 %v3500_v10  ;;  %3896 = vmatprep.subr.mxu1 %v4048_v19 }
 0x9ee   : > { %3867 = vmatprep.subr.mxu0 %v4048_v19  ;;  %3898 = vmatprep.mubr.msk.f32.mxu1 %vm4049_vm2, %v4048_v19 }
 0x9ef   : > { %3868 = vmatpush3.msra.mxu0 %v3499_v11 }
 0x9f0   : > { %3869 = vmatprep.subr.mxu0 %v4048_v19 }
 0x9f1   : > { %3870 = vmatpush3.msra.mxu0 %v3498_v12 }
 0x9f2   : > { %3872 = vmatmul.mubr.msk.f32.vlgmr.msra.gmra.mxu0 %vm737_vm1, %v4546_v1  ;;  %3885 = vmatprep.subr.mxu0 %v4048_v19 }
 0x9f3   : > { %3886 = vmatpush3.msra.mxu0 %v3509_v13  ;;  %3893 = vmatprep.mubr.msk.f32.mxu0 %vm4049_vm2, %v4048_v19 }
 0x9f4   : > { %3887 = vmatprep.subr.mxu0 %v4048_v19 }
 0x9f5   : > { %3888 = vmatpush3.msra.mxu0 %v3508_v15 }
 0x9f6   : > { %3889 = vmatprep.subr.mxu0 %v4048_v19 }
 0x9f7   : > { %3890 = vmatpush3.msra.mxu0 %v3507_v16 }
 0x9f8   : > { %3891 = vmatprep.subr.mxu0 %v4048_v19 }
 0x9f9   : > { %3892 = vmatpush3.msra.mxu0 %v3506_v17 }
 0x9fa   : > { %3894 = vmatmul.mubr.msk.f32.vlgmr.msra.gmra.mxu0 %vm737_vm1, %v4546_v1  ;;  %3906 = vmatprep.subr.mxu0 %v4048_v19 }
 0x9fb   : > { %3908 = vmatprep.mubr.msk.f32.mxu0 %vm4049_vm2, %v4048_v19 }
 0xaa1   : > { %v2128_v20 = vpop.f32.mrf.mxu0  ;;  %v2268_v21 = vpop.f32.mrf.mxu1 }
 0xaa2   : > { %v2269_v23 = vadd.f32 %v3518_v18, %v2268_v21  ;;  %v2129_v26 = vadd.f32 %v3516_v22, %v2128_v20  ;;  %v3541_v20 = vld [vmem:[%s4837_s10 + $0x1] ss:$0 sm:$0xff] }
 0xaa3   : > { %v3840_v24 = vpop.f32.mrf.mxu0  ;;  %v3862_v25 = vpop.f32.mrf.mxu1 }
 0xaa4   : > { %3897 = vmatpush3.xpose.msk.msra.mxu1 %vm1262_vm3, %v2269_v23 }
 0xaa5   : > { %3901 = vmatprep.subr.mxu1 %v4048_v19 }
 0xaa7   : > { %3899 = vmatmul.mubr.msk.f32.vlgmr.msra.gmra.mxu1 %vm1262_vm3, %v2129_v26 }
 0xaa8   : > { %3903 = vmatprep.mubr.msk.f32.mxu1 %vm4049_vm2, %v4048_v19 }
 0xaaa   : > { %v2198_v28 = vpop.f32.mrf.mxu0 }
 0xaab   : > { %v2408_v29 = vpop.f32.mrf.mxu1  ;;  %v2199_v39 = vadd.f32 %v3517_v35, %v2198_v28 }
 0xaac   : > { %v2409_v30 = vadd.f32 %v3520_v27, %v2408_v29  ;;  %v3851_v31 = vpop.f32.mrf.mxu0 }
 0xaad   : > { %v3884_v32 = vpop.f32.mrf.mxu1  ;;  %v3549_v31 = vld [vmem:[%s4840_s13 + $0x38] sm:$0xff] }
 0xaae   : > { %3907 = vmatpush3.msra.mxu0 %v2409_v30  ;;  %v3548_v32 = vld [vmem:[%s4840_s13 + $0x30] sm:$0xff] }
 0xaaf   : > { %3916 = vmatprep.subr.mxu0 %v4048_v19 }
 0xab2   : > { %v2338_v34 = vpop.f32.mrf.mxu0 }
 0xab3   : > { %v2339_v37 = vadd.f32 %v3519_v33, %v2338_v34  ;;  %v3546_v33 = vld [vmem:[%s4840_s13 + $0x20] sm:$0xff] }
 0xab4   : > { %v3873_v38 = vpop.f32.mrf.mxu0 }
 0xab5   : > { %3902 = vmatpush3.xpose.msk.msra.mxu1 %vm1262_vm3, %v2339_v37 }
 0xab6   : > { %3911 = vmatprep.subr.mxu1 %v4048_v19 }
 0xab8   : > { %3904 = vmatmul.mubr.msk.f32.vlgmr.msra.gmra.mxu1 %vm1262_vm3, %v2199_v39  ;;  %v3544_v39 = vld [vmem:[%s4838_s11 + $0x1] ss:$0 sm:$0xff] }
 0xab9   : > { %3913 = vmatprep.mubr.msk.f32.mxu1 %vm4049_vm2, %v4048_v19 }
 0xaba   : > { %v2478_v41 = vpop.f32.mrf.mxu0 }
 0xabb   : > { %v2479_v42 = vadd.f32 %v3521_v40, %v2478_v41  ;;  %v3545_v41 = vld [vmem:[%s4839_s12 + $0x1] ss:$0 sm:$0xff] }
 0xabc   : > { %v3895_v43 = vpop.f32.mrf.mxu0 }
 0xabd   : > { %3912 = vmatpush3.msra.mxu1 %v2479_v42 }
 0xabe   : > { %3923 = vmatprep.subr.mxu1 %v4048_v19 }
 0xb67   : > { %v2554_v44 = vpop.f32.mrf.mxu1 }
 0xb68   : > { %v2634_v45 = vmul.f32 0.25, %v2554_v44  ;;  %v3560_v44 = vld [vmem:[%s4842_s15 + $0x78] sm:$0xff] }
 0xb69   : > { %v3900_v46 = vpop.f32.mrf.mxu1 }
 0xb6a   : > { %v2636_v47 = vadd.f32 %v4396_v14, %v2634_v45  ;;  %v3559_v45 = vld [vmem:[%s4842_s15 + $0x70] sm:$0xff]  ;;  %v3558_v46 = vld [vmem:[%s4842_s15 + $0x68] sm:$0xff] }
 0xb6c   : > { %v2638_v48 = vsel %vm1419_vm4, %v2636_v47, -inf }
 0xb6d   : > { %2639 = vmax.xlane.f32.xlu0 %v2638_v48  ;;  %v3556_v48 = vld [vmem:[%s4842_s15 + $0x58] sm:$0xff] }
 0xb78   : > { %v2630_v49 = vpop.f32.mrf.mxu1 }
 0xb79   : > { %v2635_v50 = vmul.f32 0.25, %v2630_v49  ;;  %v3555_v49 = vld [vmem:[%s4842_s15 + $0x50] sm:$0xff] }
 0xb7a   : > { %v3905_v51 = vpop.f32.mrf.mxu1 }
 0xb7b   : > { %v2637_v52 = vadd.f32 %v4396_v14, %v2635_v50  ;;  %v3554_v50 = vld [vmem:[%s4842_s15 + $0x48] sm:$0xff]  ;;  %v3553_v51 = vld [vmem:[%s4842_s15 + $0x40] sm:$0xff] }
 0xb7d   : > { %v2641_v53 = vsel %vm1419_vm4, %v2637_v52, -inf }
 0xb7e   : > { %2642 = vmax.xlane.f32.xlu1 %v2641_v53 }
 0xbf6   : > { %v2640_v54 = vpop.xlane.xlu0 %2639 }
 0xbf7   : > { %v2644_v55 = vsub.f32 %v2636_v47, %v2640_v54  ;;  %v3557_v47 = vld [vmem:[%s4842_s15 + $0x60] sm:$0xff] }
 0xbf9   : > { %v2646_v56 = vmul.f32 1.442695, %v2644_v55 }
 0xbfb   : > { %4009 = vpow2.f32 %v2646_v56 }
 0xc07   : > { %v2643_v57 = vpop.xlane.xlu1 %2642 }
 0xc08   : > { %v4010_v58 = vpop.eup %4009  ;;  %v2645_v59 = vsub.f32 %v2637_v52, %v2643_v57  ;;  %v3551_v52 = vld [vmem:[%s4841_s14 + $0x1] ss:$0 sm:$0xff] }
 0xc09   : > { %v2650_v60 = vsel %vm1419_vm4, %v4010_v58, 0.0 }
 0xc0a   : > { %v2648_v61 = vmul.f32 1.442695, %v2645_v59  ;;  %2651 = vadd.xlane.f32.xlu0 %v2650_v60 }
 0xc0c   : > { %4011 = vpow2.f32 %v2648_v61 }
 0xc19   : > { %v4012_v62 = vpop.eup %4011 }
 0xc1a   : > { %v2653_v63 = vsel %vm1419_vm4, %v4012_v62, 0.0 }
 0xc1b   : > { %2654 = vadd.xlane.f32.xlu1 %v2653_v63 }
 0xc93   : > { %v2652_v14 = vpop.xlane.xlu0 %2651 }
 0xc94   : > { %4013 = vrcp.f32 %v2652_v14 }
 0xca1   : > { %v4014_v0 = vpop.eup %4013 }
 0xca2   : > { %v2657_v2 = vmul.f32 %v4014_v0, %v4010_v58  ;;  %v3562_v0 = vld [vmem:[%s4885_s5 + $0x1] ss:$0 sm:$0xff] }
 0xca4   : > { %v2655_v36 = vpop.xlane.xlu1 %2654  ;;  %3909 = vmatmul.mubr.msk.f32.vlgmr.msra.gmra.mxu0 %vm1419_vm4, %v2657_v2 }
 0xca5   : > { %4015 = vrcp.f32 %v2655_v36  ;;  %3917 = vmatpush3.msra.mxu0 %v3535_v3  ;;  %3920 = vmatprep.mubr.msk.f32.mxu0 %vm4049_vm2, %v4048_v19 }
 0xca6   : > { %3918 = vmatprep.subr.mxu0 %v4048_v19 }
 0xca7   : > { %3919 = vmatpush3.msra.mxu0 %v3534_v6 }
 0xca8   : > { %3930 = vmatprep.subr.mxu0 %v4048_v19 }
 0xcb2   : > { %v4016_v4 = vpop.eup %4015 }
 0xcb3   : > { %v2659_v5 = vmul.f32 %v4016_v4, %v4012_v62 }
 0xcb5   : > { %3914 = vmatmul.mubr.msk.f32.vlgmr.msra.gmra.mxu1 %vm1419_vm4, %v2659_v5 }
 0xcb6   : > { %3927 = vmatprep.mubr.msk.f32.mxu1 %vm4049_vm2, %v4048_v19  ;;  %3924 = vmatpush3.msra.mxu1 %v3537_v7 }
 0xcb7   : > { %3925 = vmatprep.subr.mxu1 %v4048_v19 }
 0xcb8   : > { %3926 = vmatpush3.msra.mxu1 %v3536_v8 }
 0xcb9   : > { %3941 = vmatprep.subr.mxu1 %v4048_v19 }
 0xd64   : > { %v2729_v9 = vpop.f32.mrf.mxu0 }
 0xd65   : > { %3921 = vmatmul.mubr.msk.f32.vlgmr.msra.gmra.mxu0 %vm1262_vm3, %v2729_v9 }
 0xd66   : > { %v3910_v10 = vpop.f32.mrf.mxu0  ;;  %3938 = vmatprep.mubr.msk.f32.mxu0 %vm4049_vm2, %v4048_v19  ;;  %3931 = vmatpush3.msra.mxu0 %v3549_v31 }
 0xd67   : > { %3932 = vmatprep.subr.mxu0 %v4048_v19 }
 0xd68   : > { %3933 = vmatpush3.msra.mxu0 %v3548_v32 }
 0xd69   : > { %3934 = vmatprep.subr.mxu0 %v4048_v19 }
 0xd75   : > { %v2802_v11 = vpop.f32.mrf.mxu1 }
 0xd76   : > { %3928 = vmatmul.mubr.msk.f32.vlgmr.msra.gmra.mxu1 %vm1262_vm3, %v2802_v11  ;;  %v3221_v11 = vld [vmem:[%s4888_s21 + $0x18] sm:$0xff] }
 0xd77   : > { %v3915_v12 = vpop.f32.mrf.mxu1  ;;  %3957 = vmatprep.mubr.msk.f32.mxu1 %vm4049_vm2, %v4048_v19  ;;  %3942 = vmatpush3.msra.mxu1 %v3560_v44 }
 0xd78   : > { %3943 = vmatprep.subr.mxu1 %v4048_v19  ;;  %v3220_v12 = vld [vmem:[%s4888_s21 + $0x10] sm:$0xff] }
 0xd79   : > { %3944 = vmatpush3.msra.mxu1 %v3559_v45 }
 0xd7a   : > { %3945 = vmatprep.subr.mxu1 %v4048_v19 }
 0xd7b   : > { %3946 = vmatpush3.msra.mxu1 %v3558_v46 }
 0xd7c   : > { %3947 = vmatprep.subr.mxu1 %v4048_v19 }
 0xd7d   : > { %3948 = vmatpush3.msra.mxu1 %v3557_v47 }
 0xd7e   : > { %3949 = vmatprep.subr.mxu1 %v4048_v19 }
 0xd7f   : > { %3950 = vmatpush3.msra.mxu1 %v3556_v48 }
 0xd80   : > { %3951 = vmatprep.subr.mxu1 %v4048_v19 }
 0xd81   : > { %3952 = vmatpush3.msra.mxu1 %v3555_v49 }
 0xd82   : > { %3953 = vmatprep.subr.mxu1 %v4048_v19 }
 0xd83   : > { %3954 = vmatpush3.msra.mxu1 %v3554_v50 }
 0xd84   : > { %3955 = vmatprep.subr.mxu1 %v4048_v19 }
 0xd85   : > { %3956 = vmatpush3.msra.mxu1 %v3553_v51 }
 0xe25   : > { %v2880_v13 = vpop.f32.mrf.mxu0 }
 0xe26   : > { %v2957_v17 = vsel %vm737_vm1, %v2880_v13, 0.0  ;;  %v3219_v13 = vld [vmem:[%s4888_s21 + $0x8] sm:$0xff] }
 0xe27   : > { %v3922_v15 = vpop.f32.mrf.mxu0 }
 0xe28   : > { %v3218_v15 = vld [vmem:[%s4888_s21] sm:$0xff] }
 0xe36   : > { %v2953_v16 = vpop.f32.mrf.mxu1 }
 0xe37   : > { %v2958_v18 = vsel %vm737_vm1, %v2953_v16, 0.0 }
 0xe38   : > { %v2959_v21 = vadd.f32 %v2958_v18, %v2957_v17  ;;  %v3929_v22 = vpop.f32.mrf.mxu1 }
 0xe3a   : > { %v2968_v23 = vadd.f32 %v3541_v20, %v2959_v21  ;;  %v3566_v21 = vld [vmem:[%s4886_s4 + $0x1] ss:$0 sm:$0xff] }
 0xe3c   : > { %v2969_v24 = vadd.f32 %v2968_v23, %v4546_v1  ;;  %v3547_v1 = vld [vmem:[%s4840_s13 + $0x28] sm:$0xff]  ;;  %v3567_v23 = vld [vmem:[%s4887_s7 + $0x1] ss:$0 sm:$0xff] }
 0xe3d   : > { %3935 = vmatpush3.msra.mxu0 %v3547_v1 }
 0xe3e   : > { %v2974_v25 = vsel %vm737_vm1, %v2969_v24, 0.0  ;;  %3936 = vmatprep.subr.mxu0 %v4048_v19 }
 0xe3f   : > { %2975 = vadd.xlane.f32.xlu0 %v2974_v25  ;;  %3937 = vmatpush3.msra.mxu0 %v3546_v33 }
 0xe40   : > { %3960 = vmatprep.subr.mxu0 %v4048_v19 }
 0xec8   : > { %v2976_v26 = vpop.xlane.xlu0 %2975 }
 0xec9   : > { %v2977_v27 = vmul.f32 0.03125, %v2976_v26  ;;  %v3306_v26 = vld [vmem:[%s4889_s24 + $0x18] sm:$0xff] }
 0xecb   : > { %v2978_v28 = vsub.f32 %v2969_v24, %v2977_v27  ;;  %v3305_v27 = vld [vmem:[%s4889_s24 + $0x10] sm:$0xff] }
 0xecd   : > { %v2979_v29 = vmul.f32 %v2978_v28, %v2978_v28 }
 0xecf   : > { %v2980_v30 = vsel %vm737_vm1, %v2979_v29, 0.0  ;;  %v3303_v29 = vld [vmem:[%s4889_s24] sm:$0xff] }
 0xed0   : > { %2981 = vadd.xlane.f32.xlu1 %v2980_v30  ;;  %v3568_v30 = vld [vmem:[%s4890_s2] ss:$0 sm:$0xff] }
 0xf59   : > { %v2982_v34 = vpop.xlane.xlu1 %2981 }
 0xf5a   : > { %v2983_v35 = vmul.f32 0.03125, %v2982_v34  ;;  %v3570_v34 = vld [vmem:[%s4891_s25] ss:$0 sm:$0xff] }
 0xf5c   : > { %v2984_v37 = vadd.f32 1e-12, %v2983_v35 }
 0xf5e   : > { %4017 = vrsqrt.f32 %v2984_v37 }
 0xf6b   : > { %v4018_v38 = vpop.eup %4017 }
 0xf6c   : > { %v2986_v40 = vmul.f32 %v4018_v38, %v2978_v28  ;;  %v3304_v28 = vld [vmem:[%s4889_s24 + $0x8] sm:$0xff] }
 0xf6e   : > { %v2993_v42 = vmul.f32 %v3544_v39, %v2986_v40 }
 0xf70   : > { %v3000_v43 = vadd.f32 %v3545_v41, %v2993_v42 }
 0xf72   : > { %3939 = vmatmul.mubr.msk.f32.vlgmr.msra.gmra.mxu0 %vm737_vm1, %v3000_v43 }
 0xf73   : > { %3968 = vmatprep.mubr.msk.f32.mxu0 %vm4049_vm2, %v4048_v19  ;;  %3961 = vmatpush3.msra.mxu0 %v3221_v11 }
 0xf74   : > { %3962 = vmatprep.subr.mxu0 %v4048_v19 }
 0xf75   : > { %3963 = vmatpush3.msra.mxu0 %v3220_v12 }
 0xf76   : > { %3964 = vmatprep.subr.mxu0 %v4048_v19 }
 0xf77   : > { %3965 = vmatpush3.msra.mxu0 %v3219_v13 }
 0xf78   : > { %3966 = vmatprep.subr.mxu0 %v4048_v19 }
 0xf79   : > { %3967 = vmatpush3.msra.mxu0 %v3218_v15 }
 0xf7a   : > { %3971 = vmatprep.subr.mxu0 %v4048_v19 }
0x1032   : > { %v3083_v53 = vpop.f32.mrf.mxu0 }
0x1033   : > { %v3084_v54 = vadd.f32 %v3551_v52, %v3083_v53 }
0x1034   : > { %v3940_v55 = vpop.f32.mrf.mxu0 }
0x1035   : > { %v3088_v56 = vmul.f32 0.044715, %v3084_v54  ;;  %v3087_v62 = vmul.f32 0.5, %v3084_v54 }
0x1037   : > { %v3089_v57 = vmul.f32 %v3088_v56, %v3084_v54 }
0x1039   : > { %v3090_v58 = vmul.f32 %v3089_v57, %v3084_v54 }
0x103b   : > { %v3091_v59 = vadd.f32 %v3090_v58, %v3084_v54 }
0x103d   : > { %v3092_v60 = vmul.f32 0.7978846, %v3091_v59 }
0x103f   : > { %4019 = vtanh.f32 %v3092_v60 }
0x104c   : > { %v4020_v61 = vpop.eup %4019 }
0x104d   : > { %v3094_v63 = vadd.f32 1.0, %v4020_v61 }
0x104f   : > { %v3095_v14 = vmul.f32 %v3094_v63, %v3087_v62 }
0x1051   : > { %3958 = vmatmul.mubr.msk.f32.vlgmr.msra.gmra.mxu1 %vm1887_vm5, %v3095_v14 }
0x1111   : > { %v3182_v2 = vpop.f32.mrf.mxu1 }
0x1112   : > { %v3183_v3 = vadd.f32 %v3562_v0, %v3182_v2 }
0x1113   : > { %v3959_v36 = vpop.f32.mrf.mxu1 }
0x1114   : > { %v3186_v4 = vadd.f32 %v3183_v3, %v3000_v43 }
0x1116   : > { %v3191_v5 = vsel %vm737_vm1, %v3186_v4, 0.0 }
0x1117   : > { %3192 = vadd.xlane.f32.xlu0 %v3191_v5 }
0x11a0   : > { %v3193_v6 = vpop.xlane.xlu0 %3192 }
0x11a1   : > { %v3194_v7 = vmul.f32 0.03125, %v3193_v6 }
0x11a3   : > { %v3195_v8 = vsub.f32 %v3186_v4, %v3194_v7 }
0x11a5   : > { %v3196_v9 = vmul.f32 %v3195_v8, %v3195_v8 }
0x11a7   : > { %v3197_v10 = vsel %vm737_vm1, %v3196_v9, 0.0 }
0x11a8   : > { %3198 = vadd.xlane.f32.xlu1 %v3197_v10 }
0x1231   : > { %v3199_v16 = vpop.xlane.xlu1 %3198 }
0x1232   : > { %v3200_v17 = vmul.f32 0.03125, %v3199_v16 }
0x1234   : > { %v3201_v18 = vadd.f32 1e-12, %v3200_v17 }
0x1236   : > { %4021 = vrsqrt.f32 %v3201_v18 }
0x1243   : > { %v4022_v20 = vpop.eup %4021 }
0x1244   : > { %v3203_v22 = vmul.f32 %v4022_v20, %v3195_v8 }
0x1246   : > { %v3210_v24 = vmul.f32 %v3566_v21, %v3203_v22 }
0x1248   : > { %v3217_v25 = vadd.f32 %v3567_v23, %v3210_v24 }
0x124a   : > { %3969 = vmatmul.mubr.msk.f32.vlgmr.msra.gmra.mxu0 %vm737_vm1, %v3217_v25 }
0x124b   : > { %3979 = vmatprep.mubr.msk.f32.mxu0 %vm4049_vm2, %v4048_v19  ;;  %3972 = vmatpush3.msra.mxu0 %v3306_v26 }
0x124c   : > { %3973 = vmatprep.subr.mxu0 %v4048_v19 }
0x124d   : > { %3974 = vmatpush3.msra.mxu0 %v3305_v27 }
0x124e   : > { %3975 = vmatprep.subr.mxu0 %v4048_v19 }
0x124f   : > { %3976 = vmatpush3.msra.mxu0 %v3304_v28 }
0x1250   : > { %3977 = vmatprep.subr.mxu0 %v4048_v19 }
0x1251   : > { %3978 = vmatpush3.msra.mxu0 %v3303_v29 }
0x130a   : > { %v3298_v31 = vpop.f32.mrf.mxu0 }
0x130b   : > { %v3299_v32 = vadd.f32 %v3568_v30, %v3298_v31 }
0x130c   : > { %v3970_v1 = vpop.f32.mrf.mxu0 }
0x130d   : > { %4023 = vtanh.f32 %v3299_v32 }
0x131a   : > { %v4024_v33 = vpop.eup %4023 }
0x131b   : > { %3980 = vmatmul.mubr.msk.f32.vlgmr.msra.gmra.mxu0 %vm737_vm1, %v4024_v33 }
0x13db   : > { %v3383_v19 = vpop.f32.mrf.mxu0 }
0x13dc   : > { %v3384_v35 = vadd.f32 %v3570_v34, %v3383_v19 }
0x13dd   : > { %v3981_v37 = vpop.f32.mrf.mxu0 }
0x13de   : > { %3387 = vst [vmem:[%s682_s0] sm:$0xff] %v3384_v35 }
0x13df PF: > { %s4893_s23 = sld [smem:[#allocation6_spill]] }
0x13e5   : > { %s39_s1 = sadd.s32 1, %s4893_s23  }
0x13e6   : > { %p36_p9 = scmp.ge.s32.totalorder %s39_s1, 4  }
0x13e8   :  { %38 = sbr.rel (!%p36_p9) target bundleno = 38 (0x26), region = 158 }

</bundles_post_ra>
